<compile_context>
chip_gen: v6e
topology: v6e:2x2x1
jax: 0.10.0
libtpu: 0.0.40
codegen_flags: <defaults>
</compile_context>

<pallas_src>
import functools

import jax
import jax.numpy as jnp
from jax.experimental import pallas as pl
from jax.experimental.pallas import tpu as pltpu

IN_DIM, HID_DIM, OUT_DIM = 784, 784, 10      # logical (PyTorch) shapes
HID_PAD, OUT_PAD = 896, 128                  # lane-dense padded shapes (multiples of 128)


def _cdiv(a, b):
    return -(-a // b)


def _round_up(n, m):
    return ((n + m - 1) // m) * m


def mlp_kernel(x_ref, w1_ref, b1_ref, w2_ref, b2_ref, o_ref):
    # x_ref: (TB, 784) f32 ; w1_ref: (784, 896) bf16 ; b1_ref: (1, 896) f32
    # w2_ref: (896, 128) bf16 ; b2_ref: (1, 128) f32 ; o_ref: (TB, 128) f32
    x = x_ref[...].astype(jnp.bfloat16)          # VPU cast, hidden under MXU work
    # Layer 1: bf16 MXU matmul with f32 accumulation; bias + ReLU epilogue in f32.
    h = jnp.dot(x, w1_ref[...], preferred_element_type=jnp.float32)
    h = jnp.maximum(h + b1_ref[...], 0.0)
    # Layer 2: hidden back to MXU in bf16, f32 accumulation, lane-dense (128) store.
    out = jnp.dot(h.astype(jnp.bfloat16), w2_ref[...],
                  preferred_element_type=jnp.float32)
    o_ref[...] = (out + b2_ref[...]).astype(o_ref.dtype)


def prepare_params(w1, b1, w2, b2):
    """One-time offline prep: pad N-dims to lane-dense shapes, cast weights to bf16.

    Padded W1 columns / b1 entries are zero -> padded hidden lanes are relu(0)=0, and
    padded W2 rows/cols are zero -> no leakage into the real 10 output columns.
    """
    w1p = jnp.zeros((IN_DIM, HID_PAD), jnp.bfloat16).at[:, :HID_DIM].set(
        w1.astype(jnp.bfloat16))
    b1p = jnp.zeros((1, HID_PAD), jnp.float32).at[0, :HID_DIM].set(b1)
    w2p = jnp.zeros((HID_PAD, OUT_PAD), jnp.bfloat16).at[:HID_DIM, :OUT_DIM].set(
        w2.astype(jnp.bfloat16))
    b2p = jnp.zeros((1, OUT_PAD), jnp.float32).at[0, :OUT_DIM].set(b2)
    return w1p, b1p, w2p, b2p


@functools.partial(jax.jit, static_argnames=("max_tile",))
def baseline_forward(x, w1p, b1p, w2p, b2p, *, max_tile=1024):
    """x: (B, 784) f32. Returns (B, 10) f32."""
    B = x.shape[0]

    # --- batch-tile selection -------------------------------------------------
    # nb = number of grid steps. Guarantee >= 2 steps for mid/large batches so both
    # v7x TensorCores get work; then TB = round_up(B/nb, 8) bounds padding waste to
    # < 8 rows in the ragged final block (whose garbage rows only affect output rows
    # that are never read).
    nb_min = 2 if B >= 256 else 1
    nb = max(_cdiv(B, max_tile), nb_min)
    TB = _round_up(_cdiv(B, nb), 8)
    if TB >= B:
        TB = B                      # single full-extent block (legal for any B)
    nb = _cdiv(B, TB)

    flops = 2 * B * (IN_DIM * HID_PAD + HID_PAD * OUT_PAD)
    bytes_accessed = (x.size * x.dtype.itemsize
                      + B * OUT_PAD * 4
                      + w1p.size * 2 + w2p.size * 2
                      + b1p.size * 4 + b2p.size * 4)

    out_padded = pl.pallas_call(
        mlp_kernel,
        out_shape=jax.ShapeDtypeStruct((B, OUT_PAD), jnp.float32),
        grid_spec=pltpu.PrefetchScalarGridSpec(
            num_scalar_prefetch=0,
            grid=(nb,),
            in_specs=[
                # x tile moves with the grid (double-buffered); last dim = full 784.
                pl.BlockSpec((TB, IN_DIM), lambda i: (i, 0)),
                # Weights / biases: constant block index -> VMEM-resident, no re-DMA.
                pl.BlockSpec((IN_DIM, HID_PAD), lambda i: (0, 0)),
                pl.BlockSpec((1, HID_PAD), lambda i: (0, 0)),
                pl.BlockSpec((HID_PAD, OUT_PAD), lambda i: (0, 0)),
                pl.BlockSpec((1, OUT_PAD), lambda i: (0, 0)),
            ],
            out_specs=pl.BlockSpec((TB, OUT_PAD), lambda i: (i, 0)),
        ),
        compiler_params=pltpu.CompilerParams(
            dimension_semantics=("parallel",),      # shard batch tiles across TCs (v7x)
            vmem_limit_bytes=32 * 1024 * 1024,      # ~17 MiB actually needed at TB=1024
        ),
        cost_estimate=pl.CostEstimate(
            flops=flops, transcendentals=0, bytes_accessed=bytes_accessed),
    )(x, w1p, b1p, w2p, b2p)

    # Strip output-lane padding only (no batch padding was materialized).
    return out_padded[:, :OUT_DIM]


def init_params(key):
    """Deterministic init mimicking PyTorch nn.Linear defaults: U(-1/sqrt(fan_in), +1/sqrt(fan_in))."""
    k1, k2, k3, k4 = jax.random.split(key, 4)
    bound1 = 1.0 / jnp.sqrt(jnp.float32(IN_DIM))
    bound2 = 1.0 / jnp.sqrt(jnp.float32(HID_DIM))
    # Stored already transposed relative to PyTorch: (in, out).
    w1 = jax.random.uniform(k1, (IN_DIM, HID_DIM), jnp.float32, -bound1, bound1)
    b1 = jax.random.uniform(k2, (HID_DIM,), jnp.float32, -bound1, bound1)
    w2 = jax.random.uniform(k3, (HID_DIM, OUT_DIM), jnp.float32, -bound2, bound2)
    b2 = jax.random.uniform(k4, (OUT_DIM,), jnp.float32, -bound2, bound2)
    return w1, b1, w2, b2


def reference_forward(x, w1, b1, w2, b2):
    h = jnp.maximum(x @ w1 + b1, 0.0)
    return h @ w2 + b2


if __name__ == "__main__":
    key = jax.random.PRNGKey(0)
    kx, kp = jax.random.split(key)

    B = 8  # small batch
    x = jax.random.normal(kx, (B, IN_DIM), jnp.float32)
    w1, b1, w2, b2 = init_params(kp)
    w1p, b1p, w2p, b2p = prepare_params(w1, b1, w2, b2)

    out = baseline_forward(x, w1p, b1p, w2p, b2p)
    out = jax.block_until_ready(out)

    ref = reference_forward(x, w1, b1, w2, b2)
    assert out.shape == (B, OUT_DIM), out.shape
    # bf16 matmul inputs with f32 accumulation -> small deviation from the f32 reference.
    assert jnp.allclose(out, ref, atol=5e-2, rtol=5e-2), "mismatch vs pure-JAX reference"

    print("KERNEL_OK")
</pallas_src>

<mosaic_0001>
module attributes {stable_mosaic.version = 11 : i64} {
  func.func @mlp_kernel(%arg0: i32, %arg1: memref<8x784xf32, #tpu.memory_space<vmem>>, %arg2: memref<784x896xbf16, #tpu.memory_space<vmem>>, %arg3: memref<1x896xf32, #tpu.memory_space<vmem>>, %arg4: memref<896x128xbf16, #tpu.memory_space<vmem>>, %arg5: memref<1x128xf32, #tpu.memory_space<vmem>>, %arg6: memref<8x128xf32, #tpu.memory_space<vmem>>) attributes {dimension_semantics = [#tpu.dimension_semantics<parallel>], iteration_bounds = array<i64: 1>, scalar_prefetch = 0 : i64, scratch_operands = 0 : i64, tpu.core_type = #tpu.core_type<tc>, window_params = [{transform_indices = @transform_0, window_bounds = array<i64: 8, 784>}, {pipeline_mode = #tpu.pipeline_mode<synchronous>, transform_indices = @transform_1, window_bounds = array<i64: 784, 896>}, {pipeline_mode = #tpu.pipeline_mode<synchronous>, transform_indices = @transform_2, window_bounds = array<i64: 1, 896>}, {pipeline_mode = #tpu.pipeline_mode<synchronous>, transform_indices = @transform_3, window_bounds = array<i64: 896, 128>}, {pipeline_mode = #tpu.pipeline_mode<synchronous>, transform_indices = @transform_4, window_bounds = array<i64: 1, 128>}, {transform_indices = @transform_5, window_bounds = array<i64: 8, 128>}]} {
    %c0 = arith.constant 0 : index
    %c0_0 = arith.constant 0 : index
    %0 = vector.load %arg1[%c0, %c0_0] : memref<8x784xf32, #tpu.memory_space<vmem>>, vector<8x784xf32>
    %1 = arith.truncf %0 : vector<8x784xf32> to vector<8x784xbf16>
    %c0_1 = arith.constant 0 : index
    %c0_2 = arith.constant 0 : index
    %2 = vector.load %arg2[%c0_1, %c0_2] : memref<784x896xbf16, #tpu.memory_space<vmem>>, vector<784x896xbf16>
    %cst = arith.constant dense<0.000000e+00> : vector<8x896xf32>
    %3 = tpu.matmul %1, %2, %cst {dimension_numbers = #tpu.dot_dimension_numbers<[1], [0], [0], [1], [0, 0, 1, 1], [], []>} : vector<8x784xbf16>, vector<784x896xbf16>, vector<8x896xf32> -> vector<8x896xf32>
    %c0_3 = arith.constant 0 : index
    %c0_4 = arith.constant 0 : index
    %4 = vector.load %arg3[%c0_3, %c0_4] : memref<1x896xf32, #tpu.memory_space<vmem>>, vector<1x896xf32>
    %5 = vector.broadcast %4 : vector<1x896xf32> to vector<8x896xf32>
    %6 = arith.addf %3, %5 : vector<8x896xf32>
    %cst_5 = arith.constant 0.000000e+00 : f32
    %7 = vector.broadcast %cst_5 : f32 to vector<8x896xf32>
    %8 = arith.maximumf %6, %7 : vector<8x896xf32>
    %9 = arith.truncf %8 : vector<8x896xf32> to vector<8x896xbf16>
    %c0_6 = arith.constant 0 : index
    %c0_7 = arith.constant 0 : index
    %10 = vector.load %arg4[%c0_6, %c0_7] : memref<896x128xbf16, #tpu.memory_space<vmem>>, vector<896x128xbf16>
    %cst_8 = arith.constant dense<0.000000e+00> : vector<8x128xf32>
    %11 = tpu.matmul %9, %10, %cst_8 {dimension_numbers = #tpu.dot_dimension_numbers<[1], [0], [0], [1], [0, 0, 1, 1], [], []>} : vector<8x896xbf16>, vector<896x128xbf16>, vector<8x128xf32> -> vector<8x128xf32>
    %c0_9 = arith.constant 0 : index
    %c0_10 = arith.constant 0 : index
    %12 = vector.load %arg5[%c0_9, %c0_10] : memref<1x128xf32, #tpu.memory_space<vmem>>, vector<1x128xf32>
    %13 = vector.broadcast %12 : vector<1x128xf32> to vector<8x128xf32>
    %14 = arith.addf %11, %13 : vector<8x128xf32>
    %c0_11 = arith.constant 0 : index
    %c0_12 = arith.constant 0 : index
    %15 = vector.load %arg6[%c0_11, %c0_12] : memref<8x128xf32, #tpu.memory_space<vmem>>, vector<8x128xf32>
    tpu.vector_store %arg6[%c0_11, %c0_12], %14 {strides = array<i32>} : memref<8x128xf32, #tpu.memory_space<vmem>>, vector<8x128xf32>,
    return
  }
  func.func @transform_0(%arg0: i32) -> (i32, i32) {
    %c0_i32 = arith.constant 0 : i32
    %c0_i32_0 = arith.constant 0 : i32
    return %arg0, %c0_i32 : i32, i32
  }
  func.func @transform_1(%arg0: i32) -> (i32, i32) {
    %c0_i32 = arith.constant 0 : i32
    %c0_i32_0 = arith.constant 0 : i32
    %c0_i32_1 = arith.constant 0 : i32
    return %c0_i32, %c0_i32_0 : i32, i32
  }
  func.func @transform_2(%arg0: i32) -> (i32, i32) {
    %c0_i32 = arith.constant 0 : i32
    %c0_i32_0 = arith.constant 0 : i32
    %c0_i32_1 = arith.constant 0 : i32
    return %c0_i32, %c0_i32_0 : i32, i32
  }
  func.func @transform_3(%arg0: i32) -> (i32, i32) {
    %c0_i32 = arith.constant 0 : i32
    %c0_i32_0 = arith.constant 0 : i32
    %c0_i32_1 = arith.constant 0 : i32
    return %c0_i32, %c0_i32_0 : i32, i32
  }
  func.func @transform_4(%arg0: i32) -> (i32, i32) {
    %c0_i32 = arith.constant 0 : i32
    %c0_i32_0 = arith.constant 0 : i32
    %c0_i32_1 = arith.constant 0 : i32
    return %c0_i32, %c0_i32_0 : i32, i32
  }
  func.func @transform_5(%arg0: i32) -> (i32, i32) {
    %c0_i32 = arith.constant 0 : i32
    %c0_i32_0 = arith.constant 0 : i32
    return %arg0, %c0_i32 : i32, i32
  }
}

</mosaic_0001>

<bundles_post_ra>
// kernel: baseline_forward.1
= control target key start
LH: loop header
LB: loop body
LE: loop exit
PB: predicated region body
PF: predicated region fallthrough
CT: control target
= control target key end

     0   :  { %10 = vsyncpa [#allocation3], 0  ;;  %s5015_s0 = inlined_call_operand.hbm [shape: f32[8,784], index: 0, kind: input, shape index: {}]   ;;  %s5016_s1 = inlined_call_operand.hbm [shape: bf16[784,896], index: 1, kind: input, shape index: {}]   ;;  %s5017_s2 = inlined_call_operand.hbm [shape: f32[1,896], index: 2, kind: input, shape index: {}]   ;;  %s5018_s3 = inlined_call_operand.hbm [shape: bf16[896,128], index: 3, kind: input, shape index: {}]   ;;  %s5019_s4 = inlined_call_operand.hbm [shape: f32[1,128], index: 4, kind: input, shape index: {}]   ;;  %s5020_s5 = inlined_call_operand.hbm [shape: f32[8,128], index: 5, kind: output, shape index: {}]  }
   0x1   :  { %11 = vsyncpa [#allocation6], 0 }
   0x2   :  { %12 = vsyncpa [#allocation9], 0 }
   0x3   :  { %13 = vsyncpa [#allocation4], 0  ;;  %s4855_s18 = smov [#allocation5]  }
   0x4   :  { %s29_s19 = sshll.u32 %s4855_s18, 4  ;;  %s30_s19 = int_to_ptr.vmem [resolvable:$true] %s29_s19 }
   0x5   :  { %s4735_s20 = scalar_lea.vmem %s30_s19, 43904  ;;  %p4740_p1 = scmp.lt.s32.totalorder %s30_s19, %s30_s19 }
   0x6   :  { %p4736_p0 = scmp.ne.s32.totalorder %s30_s19, %s4735_s20  ;;  %p4741_p2 = scmp.lt.s32.totalorder %s4735_s20, %s4735_s20 }
   0x8   :  { %p4742_p3 = por %p4741_p2, %p4740_p1 }
   0xa   :  { %p4743_p4 = pnand %p4742_p3, %p4736_p0 }
   0xc   :  { %4746 = shalt.err (!%p4743_p4)
}
   0xd   :  { %s4856_s21 = smov 448   ;;  %s4857_s22 = smov 28  }
   0xe   :  { %35 = dma.hbm_to_vmem [thread:$0]  %s5016_s1, 43904, %s30_s19, [#allocation6], %s4856_s21, %s4856_s21, %s4857_s22  }
   0xf   :  { %s4858_s25 = smov [#allocation8]  }
  0x10   :  { %s51_s26 = sshll.u32 %s4858_s25, 4  ;;  %s52_s26 = int_to_ptr.vmem [resolvable:$true] %s51_s26 }
  0x11   :  { %s4755_s27 = scalar_lea.vmem %s52_s26, 7168  ;;  %p4760_p6 = scmp.lt.s32.totalorder %s52_s26, %s52_s26 }
  0x12   :  { %p4756_p5 = scmp.ne.s32.totalorder %s52_s26, %s4755_s27  ;;  %p4761_p7 = scmp.lt.s32.totalorder %s4755_s27, %s4755_s27 }
  0x14   :  { %p4762_p8 = por %p4761_p7, %p4760_p6 }
  0x16   :  { %p4763_p9 = pnand %p4762_p8, %p4756_p5 }
  0x18   :  { %4766 = shalt.err (!%p4763_p9)
}
  0x19   :  { %s4859_s28 = smov 64   ;;  %s4860_s29 = smov 4  }
  0x1a   :  { %57 = dma.hbm_to_vmem [thread:$0]  %s5018_s3, 7168, %s52_s26, [#allocation9], %s4859_s28, %s4859_s28, %s4860_s29  }
  0x1b   :  { %s4861_s7 = smov [#allocation2]   ;;  %s4862_s9 = smov [#allocation7]  }
  0x1c   :  { %s20_s8 = sshll.u32 %s4861_s7, 4  ;;  %s42_s1 = sshll.u32 %s4862_s9, 4  ;;  %s21_s8 = int_to_ptr.vmem [resolvable:$true] %s20_s8  ;;  %s43_s1 = int_to_ptr.vmem [resolvable:$true] %s42_s1 }
  0x1d   :  { %s4775_s10 = scalar_lea.vmem %s21_s8, 896  ;;  %p4780_p11 = scmp.lt.s32.totalorder %s21_s8, %s21_s8 }
  0x1e   :  { %p4776_p10 = scmp.ne.s32.totalorder %s21_s8, %s4775_s10  ;;  %p4781_p12 = scmp.lt.s32.totalorder %s4775_s10, %s4775_s10 }
  0x20   :  { %p4782_p13 = por %p4781_p12, %p4780_p11 }
  0x22   :  { %p4783_p0 = pnand %p4782_p13, %p4776_p10 }
  0x24   :  { %4786 = shalt.err (!%p4783_p0)
}
  0x25   :  { %23 = dma.hbm_to_vmem [thread:$0]  %s5015_s0, 896, %s21_s8, [#allocation3]  }
  0x26   :  { %s4795_s13 = scalar_lea.vmem %s43_s1, 112  ;;  %s4799_s3 = scalar_lea.vmem %s43_s1, 128 }
  0x27   :  { %p4796_p1 = scmp.ne.s32.totalorder %s43_s1, %s4795_s13  ;;  %p4800_p2 = scmp.lt.s32.totalorder %s43_s1, %s43_s1 }
  0x28   :  { %p4801_p3 = scmp.lt.s32.totalorder %s4799_s3, %s4795_s13 }
  0x2a   :  { %p4802_p4 = por %p4801_p3, %p4800_p2 }
  0x2c   :  { %p4803_p5 = pnand %p4802_p4, %p4796_p1 }
  0x2e   :  { %4806 = shalt.err (!%p4803_p5)
}
  0x2f   :  { %45 = dma.hbm_to_vmem [thread:$0]  %s5017_s2, 112, %s43_s1, [#allocation6]  }
  0x30   :  { %s4863_s16 = smov [#allocation10]  }
  0x31   :  { %s64_s17 = sshll.u32 %s4863_s16, 4  ;;  %s65_s17 = int_to_ptr.vmem [resolvable:$true] %s64_s17 }
  0x32   :  { %s4815_s18 = scalar_lea.vmem %s65_s17, 16  ;;  %s4819_s19 = scalar_lea.vmem %s65_s17, 32 }
  0x33   :  { %p4816_p6 = scmp.ne.s32.totalorder %s65_s17, %s4815_s18  ;;  %p4820_p7 = scmp.lt.s32.totalorder %s65_s17, %s65_s17 }
  0x34   :  { %p4821_p8 = scmp.lt.s32.totalorder %s4819_s19, %s4815_s18 }
  0x36   :  { %p4822_p9 = por %p4821_p8, %p4820_p7 }
  0x38   :  { %p4823_p10 = pnand %p4822_p9, %p4816_p6 }
  0x3a   :  { %4826 = shalt.err (!%p4823_p10)
}
  0x3b   :  { %67 = dma.hbm_to_vmem [thread:$0]  %s5019_s4, 16, %s65_s17, [#allocation9]  }
  0x3c   :  { %4847 = dma.done.wait [#allocation3], 896  }
  0x3d   :  { %4848 = vsyncadd [#allocation3], 4294966400 }
  0x3e   :  { %4849 = dma.done.wait [#allocation6], 44016  }
  0x3f   :  { %4850 = vsyncadd [#allocation6], 4294923280 }
  0x40   :  { %4851 = dma.done.wait [#allocation9], 7184  }
  0x41   :  { %4852 = vsyncadd [#allocation9], 4294960112  ;;  %v4180_v0 = vld [vmem:[#allocation5 + $0x18c] ss:$28 sps:$4 sm:$0xff]   ;;  %v4186_v4 = vld [vmem:[#allocation5 + $0x154] ss:$28 sps:$4 sm:$0xff]  }
  0x42   :  { %v4182_v1 = vld [vmem:[#allocation5 + $0x50c] ss:$28 sps:$4 sm:$0xff]   ;;  %2295 = vmatprep.subr.bf16.mxu0 %v4180_v0  ;;  %v4188_v5 = vld [vmem:[#allocation5 + $0x4d4] ss:$28 sps:$4 sm:$0xff]   ;;  %v4192_v8 = vld [vmem:[#allocation5 + $0x11c] ss:$28 sps:$4 sm:$0xff]  }
  0x43   :  { %v4184_v2 = vld [vmem:[#allocation5 + $0x188] ss:$28 sps:$4 sm:$0xff]   ;;  %2336 = vmatprep.subr.bf16.mxu1 %v4182_v1  ;;  %v4190_v6 = vld [vmem:[#allocation5 + $0x150] ss:$28 sps:$4 sm:$0xff]   ;;  %v4194_v9 = vld [vmem:[#allocation5 + $0x49c] ss:$28 sps:$4 sm:$0xff]  }
  0x44   :  { %v4185_v3 = vld [vmem:[#allocation5 + $0x508] ss:$28 sps:$4 sm:$0xff]   ;;  %2296 = vmatpush1.bf16.msra.mxu0 %v4184_v2  ;;  %v4191_v7 = vld [vmem:[#allocation5 + $0x4d0] ss:$28 sps:$4 sm:$0xff]   ;;  %v4196_v10 = vld [vmem:[#allocation5 + $0x118] ss:$28 sps:$4 sm:$0xff]  }
  0x45   :  { %2337 = vmatpush1.bf16.msra.mxu1 %v4185_v3  ;;  %2297 = vmatprep.subr.bf16.mxu0 %v4186_v4  ;;  %v4197_v11 = vld [vmem:[#allocation5 + $0x498] ss:$28 sps:$4 sm:$0xff]   ;;  %v4198_v12 = vld [vmem:[#allocation5 + $0xe4] ss:$28 sps:$4 sm:$0xff]   ;;  %v4204_v16 = vld [vmem:[#allocation5 + $0xac] ss:$28 sps:$4 sm:$0xff]  }
  0x46   :  { %2338 = vmatprep.subr.bf16.mxu1 %v4188_v5  ;;  %v4200_v13 = vld [vmem:[#allocation5 + $0x464] ss:$28 sps:$4 sm:$0xff]   ;;  %v4206_v17 = vld [vmem:[#allocation5 + $0x42c] ss:$28 sps:$4 sm:$0xff]   ;;  %v4210_v20 = vld [vmem:[#allocation5 + $0x74] ss:$28 sps:$4 sm:$0xff]  }
  0x47   :  { %v4202_v14 = vld [vmem:[#allocation5 + $0xe0] ss:$28 sps:$4 sm:$0xff]   ;;  %v4208_v18 = vld [vmem:[#allocation5 + $0xa8] ss:$28 sps:$4 sm:$0xff]   ;;  %v4212_v21 = vld [vmem:[#allocation5 + $0x3f4] ss:$28 sps:$4 sm:$0xff]  }
  0x48   :  { %2298 = vmatpush1.bf16.msra.mxu0 %v4190_v6  ;;  %v4203_v15 = vld [vmem:[#allocation5 + $0x460] ss:$28 sps:$4 sm:$0xff]   ;;  %v4209_v19 = vld [vmem:[#allocation5 + $0x428] ss:$28 sps:$4 sm:$0xff]   ;;  %v4214_v22 = vld [vmem:[#allocation5 + $0x70] ss:$28 sps:$4 sm:$0xff]  }
  0x49   :  { %2339 = vmatpush1.bf16.msra.mxu1 %v4191_v7  ;;  %2299 = vmatprep.subr.bf16.mxu0 %v4192_v8  ;;  %v4215_v23 = vld [vmem:[#allocation5 + $0x3f0] ss:$28 sps:$4 sm:$0xff]   ;;  %v4216_v24 = vld [vmem:[#allocation5 + $0x3c] ss:$28 sps:$4 sm:$0xff]   ;;  %v4222_v28 = vld [vmem:[#allocation5 + $0x4] ss:$28 sps:$4 sm:$0xff]  }
  0x4a   :  { %2340 = vmatprep.subr.bf16.mxu1 %v4194_v9  ;;  %v4218_v25 = vld [vmem:[#allocation5 + $0x3bc] ss:$28 sps:$4 sm:$0xff]   ;;  %v4224_v29 = vld [vmem:[#allocation5 + $0x384] ss:$28 sps:$4 sm:$0xff]   ;;  %v4228_v32 = vld [vmem:[#allocation5 + $0x34c] ss:$28 sps:$4 sm:$0xff]  }
  0x4b   :  { %v4220_v26 = vld [vmem:[#allocation5 + $0x38] ss:$28 sps:$4 sm:$0xff]   ;;  %v4226_v30 = vld [vmem:[#allocation5] ss:$28 sps:$4 sm:$0xff]   ;;  %v4230_v33 = vld [vmem:[#allocation5 + $0x6cc] ss:$28 sps:$4 sm:$0xff]  }
  0x4c   :  { %2300 = vmatpush1.bf16.msra.mxu0 %v4196_v10  ;;  %v4221_v27 = vld [vmem:[#allocation5 + $0x3b8] ss:$28 sps:$4 sm:$0xff]   ;;  %v4227_v31 = vld [vmem:[#allocation5 + $0x380] ss:$28 sps:$4 sm:$0xff]   ;;  %v4232_v34 = vld [vmem:[#allocation5 + $0x348] ss:$28 sps:$4 sm:$0xff]  }
  0x4d   :  { %2341 = vmatpush1.bf16.msra.mxu1 %v4197_v11  ;;  %2301 = vmatprep.subr.bf16.mxu0 %v4198_v12  ;;  %v4233_v35 = vld [vmem:[#allocation5 + $0x6c8] ss:$28 sps:$4 sm:$0xff]   ;;  %v4234_v36 = vld [vmem:[#allocation5 + $0x314] ss:$28 sps:$4 sm:$0xff]   ;;  %v4240_v40 = vld [vmem:[#allocation5 + $0x2dc] ss:$28 sps:$4 sm:$0xff]  }
  0x4e   :  { %2342 = vmatprep.subr.bf16.mxu1 %v4200_v13  ;;  %v4236_v37 = vld [vmem:[#allocation5 + $0x694] ss:$28 sps:$4 sm:$0xff]   ;;  %v4242_v41 = vld [vmem:[#allocation5 + $0x65c] ss:$28 sps:$4 sm:$0xff]   ;;  %v4246_v44 = vld [vmem:[#allocation5 + $0x2a4] ss:$28 sps:$4 sm:$0xff]  }
  0x4f   :  { %v4238_v38 = vld [vmem:[#allocation5 + $0x310] ss:$28 sps:$4 sm:$0xff]   ;;  %v4244_v42 = vld [vmem:[#allocation5 + $0x2d8] ss:$28 sps:$4 sm:$0xff]   ;;  %v4248_v45 = vld [vmem:[#allocation5 + $0x624] ss:$28 sps:$4 sm:$0xff]  }
  0x50   :  { %2302 = vmatpush1.bf16.msra.mxu0 %v4202_v14  ;;  %v4239_v39 = vld [vmem:[#allocation5 + $0x690] ss:$28 sps:$4 sm:$0xff]   ;;  %v4245_v43 = vld [vmem:[#allocation5 + $0x658] ss:$28 sps:$4 sm:$0xff]   ;;  %v4250_v47 = vld [vmem:[#allocation5 + $0x2a0] ss:$28 sps:$4 sm:$0xff]  }
  0x51   :  { %2343 = vmatpush1.bf16.msra.mxu1 %v4203_v15  ;;  %2303 = vmatprep.subr.bf16.mxu0 %v4204_v16  ;;  %v85_v46 = vld [vmem:[#allocation2 + $0x8] sm:$0xff]  ;;  %v4251_v48 = vld [vmem:[#allocation5 + $0x620] ss:$28 sps:$4 sm:$0xff]   ;;  %v4252_v51 = vld [vmem:[#allocation5 + $0x26c] ss:$28 sps:$4 sm:$0xff]   ;;  %v4864_v16 = vmov 0  }
  0x52   :  { %2344 = vmatprep.subr.bf16.mxu1 %v4206_v17  ;;  %v4913_v49 = vpack.c.bf16 %v85_v46, %v85_v46  ;;  %v87_v50 = vld [vmem:[#allocation2 + $0x18] sm:$0xff]  ;;  %v4254_v53 = vld [vmem:[#allocation5 + $0x5ec] ss:$28 sps:$4 sm:$0xff]   ;;  %v4258_v56 = vld [vmem:[#allocation5 + $0x234] ss:$28 sps:$4 sm:$0xff]   ;;  %vm2291_vm0 = vcmask 130048  }
  0x53   :  { %v4915_v52 = vpack.c.bf16 %v87_v50, %v87_v50  ;;  %v4256_v54 = vld [vmem:[#allocation5 + $0x268] ss:$28 sps:$4 sm:$0xff]   ;;  %v4260_v57 = vld [vmem:[#allocation5 + $0x5b4] ss:$28 sps:$4 sm:$0xff]   ;;  %v4264_v60 = vld [vmem:[#allocation5 + $0x1fc] ss:$28 sps:$4 sm:$0xff]  }
  0x54   :  { %2304 = vmatpush1.bf16.msra.mxu0 %v4208_v18  ;;  %2327 = vmatprep.mubr.bf16.mxu0 %v4913_v49  ;;  %v4257_v55 = vld [vmem:[#allocation5 + $0x5e8] ss:$28 sps:$4 sm:$0xff]   ;;  %v4262_v58 = vld [vmem:[#allocation5 + $0x230] ss:$28 sps:$4 sm:$0xff]   ;;  %v4266_v61 = vld [vmem:[#allocation5 + $0x57c] ss:$28 sps:$4 sm:$0xff]  }
  0x55   :  { %2345 = vmatpush1.bf16.msra.mxu1 %v4209_v19  ;;  %2305 = vmatprep.subr.bf16.mxu0 %v4210_v20  ;;  %v4263_v59 = vld [vmem:[#allocation5 + $0x5b0] ss:$28 sps:$4 sm:$0xff]   ;;  %v4268_v62 = vld [vmem:[#allocation5 + $0x1f8] ss:$28 sps:$4 sm:$0xff]   ;;  %v4270_v0 = vld [vmem:[#allocation5 + $0x1c4] ss:$28 sps:$4 sm:$0xff]  }
  0x56   :  { %2346 = vmatprep.subr.bf16.mxu1 %v4212_v21  ;;  %2368 = vmatprep.mubr.bf16.mxu1 %v4915_v52  ;;  %v4269_v63 = vld [vmem:[#allocation5 + $0x578] ss:$28 sps:$4 sm:$0xff]   ;;  %v4272_v1 = vld [vmem:[#allocation5 + $0x544] ss:$28 sps:$4 sm:$0xff]   ;;  %v84_v4 = vld [vmem:[#allocation2] sm:$0xff]  ;;  %vm4866_vm1 = vmmov 0  }
  0x57   :  { %v4274_v2 = vld [vmem:[#allocation5 + $0x1c0] ss:$28 sps:$4 sm:$0xff]   ;;  %v4278_v6 = vld [vmem:[#allocation5 + $0x88c] ss:$28 sps:$4 sm:$0xff]   ;;  %v4919_v8 = vpack.c.bf16 %v84_v4, %v84_v4  ;;  %v4284_v12 = vld [vmem:[#allocation5 + $0x854] ss:$28 sps:$4 sm:$0xff]  }
  0x58   :  { %2306 = vmatpush1.bf16.msra.mxu0 %v4214_v22  ;;  %v4275_v3 = vld [vmem:[#allocation5 + $0x540] ss:$28 sps:$4 sm:$0xff]   ;;  %v4276_v10 = vld [vmem:[#allocation5 + $0x888] ss:$28 sps:$4 sm:$0xff]   ;;  %v4287_v13 = vld [vmem:[#allocation5 + $0x194] ss:$28 sps:$4 sm:$0xff]  }
  0x59   :  { %2347 = vmatpush1.bf16.msra.mxu1 %v4215_v23  ;;  %2307 = vmatprep.subr.bf16.mxu0 %v4216_v24  ;;  %v86_v5 = vld [vmem:[#allocation2 + $0x10] sm:$0xff]  ;;  %v4281_v7 = vld [vmem:[#allocation5 + $0xa84] ss:$28 sps:$4 sm:$0xff]   ;;  %v4282_v14 = vld [vmem:[#allocation5 + $0x850] ss:$28 sps:$4 sm:$0xff]   ;;  %s4867_s2 = smov [#allocation11]  }
  0x5a   :  { %2348 = vmatprep.subr.bf16.mxu1 %v4218_v25  ;;  %v4921_v9 = vpack.c.bf16 %v86_v5, %v86_v5  ;;  %v4279_v11 = vld [vmem:[#allocation5 + $0xa80] ss:$28 sps:$4 sm:$0xff]   ;;  %v4285_v18 = vld [vmem:[#allocation5 + $0x190] ss:$28 sps:$4 sm:$0xff]   ;;  %v4288_v20 = vld [vmem:[#allocation5 + $0x818] ss:$28 sps:$4 sm:$0xff]  }
  0x5b   :  { %v90_v15 = vld [vmem:[#allocation2 + $0x30] sm:$0xff]  ;;  %v4296_v22 = vld [vmem:[#allocation5 + $0x7e4] ss:$28 sps:$4 sm:$0xff]   ;;  %v4354_v4 = vld [vmem:[#allocation5 + $0x930] ss:$28 sps:$4 sm:$0xff]   ;;  %s3583_s4 = sshll.u32 %s4867_s2, 4  ;;  %s3584_s4 = int_to_ptr.vmem [resolvable:$true] %s3583_s4 }
  0x5c   :  { %2308 = vmatpush1.bf16.msra.mxu0 %v4220_v26  ;;  %v4290_v17 = vld [vmem:[#allocation5 + $0x81c] ss:$28 sps:$4 sm:$0xff]   ;;  %v4926_v19 = vpack.c.bf16 %v90_v15, %v90_v15  ;;  %v4299_v25 = vld [vmem:[#allocation5 + $0x124] ss:$28 sps:$4 sm:$0xff]   ;;  %v4302_v26 = vld [vmem:[#allocation5 + $0x7ac] ss:$28 sps:$4 sm:$0xff]   ;;  %p4832_p12 = scmp.lt.s32.totalorder %s3584_s4, %s3584_s4 }
  0x5d   :  { %2349 = vmatpush1.bf16.msra.mxu1 %v4221_v27  ;;  %2309 = vmatprep.subr.bf16.mxu0 %v4222_v28  ;;  %v4293_v21 = vld [vmem:[#allocation5 + $0x15c] ss:$28 sps:$4 sm:$0xff]   ;;  %v4300_v28 = vld [vmem:[#allocation5 + $0x7a8] ss:$28 sps:$4 sm:$0xff]   ;;  %v4359_v5 = vld [vmem:[#allocation5 + $0x274] ss:$28 sps:$4 sm:$0xff]  }
  0x5e   :  { %2350 = vmatprep.subr.bf16.mxu1 %v4224_v29  ;;  %v4291_v23 = vld [vmem:[#allocation5 + $0x158] ss:$28 sps:$4 sm:$0xff]   ;;  %v4294_v24 = vld [vmem:[#allocation5 + $0x7e0] ss:$28 sps:$4 sm:$0xff]   ;;  %v4305_v29 = vld [vmem:[#allocation5 + $0xec] ss:$28 sps:$4 sm:$0xff]  }
  0x5f   :  { %v4297_v27 = vld [vmem:[#allocation5 + $0x120] ss:$28 sps:$4 sm:$0xff]   ;;  %v4324_v46 = vld [vmem:[#allocation5 + $0xa48] ss:$28 sps:$4 sm:$0xff]   ;;  %s4827_s21 = scalar_lea.vmem %s3584_s4, 128 }
  0x60   :  { %2310 = vmatpush1.bf16.msra.mxu0 %v4226_v30  ;;  %v4308_v30 = vld [vmem:[#allocation5 + $0x774] ss:$28 sps:$4 sm:$0xff]   ;;  %v4327_v50 = vld [vmem:[#allocation5 + $0x8] ss:$28 sps:$4 sm:$0xff]   ;;  %p4828_p11 = scmp.ne.s32.totalorder %s3584_s4, %s4827_s21  ;;  %p4833_p13 = scmp.lt.s32.totalorder %s4827_s21, %s4827_s21 }
  0x61   :  { %2351 = vmatpush1.bf16.msra.mxu1 %v4227_v31  ;;  %2311 = vmatprep.subr.bf16.mxu0 %v4228_v32  ;;  %v4303_v31 = vld [vmem:[#allocation5 + $0xe8] ss:$28 sps:$4 sm:$0xff]   ;;  %v4306_v32 = vld [vmem:[#allocation5 + $0x770] ss:$28 sps:$4 sm:$0xff]  }
  0x62   :  { %2352 = vmatprep.subr.bf16.mxu1 %v4230_v33  ;;  %v4311_v33 = vld [vmem:[#allocation5 + $0xb4] ss:$28 sps:$4 sm:$0xff]   ;;  %v4371_v15 = vld [vmem:[#allocation5 + $0x204] ss:$28 sps:$4 sm:$0xff]   ;;  %p4834_p0 = por %p4833_p13, %p4832_p12 }
  0x64   :  { %2312 = vmatpush2.bf16.msra.mxu0 %v4232_v34  ;;  %v4314_v34 = vld [vmem:[#allocation5 + $0x73c] ss:$28 sps:$4 sm:$0xff]   ;;  %p4835_p1 = pnand %p4834_p0, %p4828_p11 }
  0x65   :  { %2353 = vmatpush2.bf16.msra.mxu1 %v4233_v35  ;;  %2313 = vmatprep.subr.bf16.mxu0 %v4234_v36  ;;  %v89_v35 = vld [vmem:[#allocation2 + $0x28] sm:$0xff] }
  0x66   :  { %2354 = vmatprep.subr.bf16.mxu1 %v4236_v37  ;;  %v4931_v36 = vpack.c.bf16 %v89_v35, %v89_v35  ;;  %v4309_v37 = vld [vmem:[#allocation5 + $0xb0] ss:$28 sps:$4 sm:$0xff]   ;;  %v4395_v35 = vld [vmem:[#allocation5 + $0x824] ss:$28 sps:$4 sm:$0xff]  }
  0x68   :  { %2314 = vmatpush2.bf16.msra.mxu0 %v4238_v38  ;;  %v4312_v38 = vld [vmem:[#allocation5 + $0x738] ss:$28 sps:$4 sm:$0xff]  }
  0x69   :  { %2355 = vmatpush2.bf16.msra.mxu1 %v4239_v39  ;;  %2315 = vmatprep.subr.bf16.mxu0 %v4240_v40  ;;  %v4317_v39 = vld [vmem:[#allocation5 + $0x7c] ss:$28 sps:$4 sm:$0xff]   ;;  %v4320_v40 = vld [vmem:[#allocation5 + $0x704] ss:$28 sps:$4 sm:$0xff]  }
  0x6a   :  { %2356 = vmatprep.subr.bf16.mxu1 %v4242_v41  ;;  %v4315_v41 = vld [vmem:[#allocation5 + $0x78] ss:$28 sps:$4 sm:$0xff]  }
  0x6c   :  { %2316 = vmatpush2.bf16.msra.mxu0 %v4244_v42  ;;  %v4318_v42 = vld [vmem:[#allocation5 + $0x700] ss:$28 sps:$4 sm:$0xff]  }
  0x6d   :  { %2357 = vmatpush2.bf16.msra.mxu1 %v4245_v43  ;;  %2317 = vmatprep.subr.bf16.mxu0 %v4246_v44  ;;  %v4323_v43 = vld [vmem:[#allocation5 + $0x44] ss:$28 sps:$4 sm:$0xff]   ;;  %v4326_v44 = vld [vmem:[#allocation5 + $0xa4c] ss:$28 sps:$4 sm:$0xff]  }
  0x6e   :  { %2358 = vmatprep.subr.bf16.mxu1 %v4248_v45  ;;  %v4321_v45 = vld [vmem:[#allocation5 + $0x40] ss:$28 sps:$4 sm:$0xff]  }
  0x70   :  { %2318 = vmatpush2.bf16.msra.mxu0 %v4250_v47  ;;  %v4329_v47 = vld [vmem:[#allocation5 + $0xc] ss:$28 sps:$4 sm:$0xff]  }
  0x71   :  { %2359 = vmatpush2.bf16.msra.mxu1 %v4251_v48  ;;  %2319 = vmatprep.subr.bf16.mxu0 %v4252_v51  ;;  %v4332_v48 = vld [vmem:[#allocation5 + $0xa14] ss:$28 sps:$4 sm:$0xff]  }
  0x72   :  { %2360 = vmatprep.subr.bf16.mxu1 %v4254_v53  ;;  %v4330_v51 = vld [vmem:[#allocation5 + $0xa10] ss:$28 sps:$4 sm:$0xff]  }
  0x73   :  { %v4335_v53 = vld [vmem:[#allocation5 + $0x354] ss:$28 sps:$4 sm:$0xff]  }
  0x74   :  { %2320 = vmatpush2.bf16.msra.mxu0 %v4256_v54  ;;  %v4338_v54 = vld [vmem:[#allocation5 + $0x9dc] ss:$28 sps:$4 sm:$0xff]  }
  0x75   :  { %2361 = vmatpush2.bf16.msra.mxu1 %v4257_v55  ;;  %2321 = vmatprep.subr.bf16.mxu0 %v4258_v56  ;;  %v4333_v55 = vld [vmem:[#allocation5 + $0x350] ss:$28 sps:$4 sm:$0xff]   ;;  %v4336_v56 = vld [vmem:[#allocation5 + $0x9d8] ss:$28 sps:$4 sm:$0xff]  }
  0x76   :  { %2362 = vmatprep.subr.bf16.mxu1 %v4260_v57  ;;  %v4341_v57 = vld [vmem:[#allocation5 + $0x31c] ss:$28 sps:$4 sm:$0xff]  }
  0x78   :  { %2322 = vmatpush2.bf16.msra.mxu0 %v4262_v58  ;;  %v4344_v58 = vld [vmem:[#allocation5 + $0x9a4] ss:$28 sps:$4 sm:$0xff]  }
  0x79   :  { %2363 = vmatpush2.bf16.msra.mxu1 %v4263_v59  ;;  %2323 = vmatprep.subr.bf16.mxu0 %v4264_v60  ;;  %v4339_v59 = vld [vmem:[#allocation5 + $0x318] ss:$28 sps:$4 sm:$0xff]   ;;  %v4342_v60 = vld [vmem:[#allocation5 + $0x9a0] ss:$28 sps:$4 sm:$0xff]  }
  0x7a   :  { %2364 = vmatprep.subr.bf16.mxu1 %v4266_v61  ;;  %v4347_v61 = vld [vmem:[#allocation5 + $0x2e4] ss:$28 sps:$4 sm:$0xff]  }
  0x7c   :  { %2324 = vmatpush2.bf16.msra.mxu0 %v4268_v62  ;;  %v4350_v62 = vld [vmem:[#allocation5 + $0x96c] ss:$28 sps:$4 sm:$0xff]  }
  0x7d   :  { %2365 = vmatpush2.bf16.msra.mxu1 %v4269_v63  ;;  %2325 = vmatprep.subr.bf16.mxu0 %v4270_v0  ;;  %v4345_v63 = vld [vmem:[#allocation5 + $0x2e0] ss:$28 sps:$4 sm:$0xff]   ;;  %v4348_v0 = vld [vmem:[#allocation5 + $0x968] ss:$28 sps:$4 sm:$0xff]  }
  0x7e   :  { %2366 = vmatprep.subr.bf16.mxu1 %v4272_v1  ;;  %v4353_v1 = vld [vmem:[#allocation5 + $0x2ac] ss:$28 sps:$4 sm:$0xff]  }
  0x80   :  { %2326 = vmatpush2.bf16.msra.mxu0 %v4274_v2  ;;  %v4356_v2 = vld [vmem:[#allocation5 + $0x934] ss:$28 sps:$4 sm:$0xff]  }
  0x81   :  { %2367 = vmatpush2.bf16.msra.mxu1 %v4275_v3  ;;  %2377 = vmatprep.subr.bf16.mxu0 %v4278_v6  ;;  %v4351_v3 = vld [vmem:[#allocation5 + $0x2a8] ss:$28 sps:$4 sm:$0xff]   ;;  %v4362_v6 = vld [vmem:[#allocation5 + $0x8fc] ss:$28 sps:$4 sm:$0xff]  }
  0x82   :  { %2432 = vmatprep.subr.bf16.mxu1 %v4281_v7  ;;  %v4357_v7 = vld [vmem:[#allocation5 + $0x270] ss:$28 sps:$4 sm:$0xff]  }
  0x83   :  { %2328 = vmatmul.mubr.bf16.vlgmr.msra.gmra.mxu0 %v4919_v8 }
  0x84   :  { %2369 = vmatmul.mubr.bf16.vlgmr.msra.gmra.mxu1 %v4921_v9  ;;  %2378 = vmatpush1.bf16.msra.mxu0 %v4276_v10  ;;  %v4360_v10 = vld [vmem:[#allocation5 + $0x8f8] ss:$28 sps:$4 sm:$0xff]  }
  0x85   :  { %2433 = vmatpush1.bf16.msra.mxu1 %v4279_v11  ;;  %2379 = vmatprep.subr.bf16.mxu0 %v4284_v12  ;;  %v4365_v11 = vld [vmem:[#allocation5 + $0x23c] ss:$28 sps:$4 sm:$0xff]   ;;  %v4368_v12 = vld [vmem:[#allocation5 + $0x8c4] ss:$28 sps:$4 sm:$0xff]  }
  0x86   :  { %2450 = vmatprep.mubr.bf16.mxu1 %v4864_v16  ;;  %2459 = vmatprep.subr.bf16.mxu1 %v4287_v13  ;;  %v4363_v13 = vld [vmem:[#allocation5 + $0x238] ss:$28 sps:$4 sm:$0xff]  }
  0x87   :  { %2409 = vmatprep.mubr.bf16.mxu0 %v4931_v36 }
  0x88   :  { %2380 = vmatpush1.bf16.msra.mxu0 %v4282_v14  ;;  %v4366_v14 = vld [vmem:[#allocation5 + $0x8c0] ss:$28 sps:$4 sm:$0xff]  }
  0x89   :  { %2381 = vmatprep.subr.bf16.mxu0 %v4290_v17  ;;  %v88_v17 = vld [vmem:[#allocation2 + $0x20] sm:$0xff] }
  0x8c   :  { %3937 = vmatmul.mubr.msk.bf16.vlgmr.msra.gmra.mxu1 %vm2291_vm0, %v4926_v19  ;;  %2382 = vmatpush1.bf16.msra.mxu0 %v4288_v20  ;;  %v4369_v20 = vld [vmem:[#allocation5 + $0x200] ss:$28 sps:$4 sm:$0xff]  }
  0x8d   :  { %2460 = vmatpush1.bf16.msra.mxu1 %v4285_v18  ;;  %2383 = vmatprep.subr.bf16.mxu0 %v4296_v22  ;;  %v4374_v18 = vld [vmem:[#allocation5 + $0x514] ss:$28 sps:$4 sm:$0xff]  }
  0x8e   :  { %2461 = vmatprep.subr.bf16.mxu1 %v4293_v21  ;;  %2491 = vmatprep.mubr.bf16.mxu1 %v4913_v49  ;;  %v4934_v21 = vpack.c.bf16 %v88_v17, %v88_v17  ;;  %v4372_v22 = vld [vmem:[#allocation5 + $0x510] ss:$28 sps:$4 sm:$0xff]  }
  0x8f   :  { %v4455_v17 = vld [vmem:[#allocation5 + $0x974] ss:$28 sps:$4 sm:$0xff]  }
  0x90   :  { %2384 = vmatpush1.bf16.msra.mxu0 %v4294_v24  ;;  %v4380_v24 = vld [vmem:[#allocation5 + $0x4dc] ss:$28 sps:$4 sm:$0xff]  }
  0x91   :  { %2462 = vmatpush1.bf16.msra.mxu1 %v4291_v23  ;;  %2385 = vmatprep.subr.bf16.mxu0 %v4302_v26  ;;  %v4377_v23 = vld [vmem:[#allocation5 + $0x1cc] ss:$28 sps:$4 sm:$0xff]   ;;  %v4378_v26 = vld [vmem:[#allocation5 + $0x4d8] ss:$28 sps:$4 sm:$0xff]  }
  0x92   :  { %2463 = vmatprep.subr.bf16.mxu1 %v4299_v25  ;;  %v4375_v25 = vld [vmem:[#allocation5 + $0x1c8] ss:$28 sps:$4 sm:$0xff]  }
  0x94   :  { %2386 = vmatpush1.bf16.msra.mxu0 %v4300_v28  ;;  %v4386_v28 = vld [vmem:[#allocation5 + $0x4a4] ss:$28 sps:$4 sm:$0xff]  }
  0x95   :  { %2464 = vmatpush1.bf16.msra.mxu1 %v4297_v27  ;;  %2387 = vmatprep.subr.bf16.mxu0 %v4308_v30  ;;  %v4383_v27 = vld [vmem:[#allocation5 + $0x894] ss:$28 sps:$4 sm:$0xff]   ;;  %v4384_v30 = vld [vmem:[#allocation5 + $0x4a0] ss:$28 sps:$4 sm:$0xff]  }
  0x96   :  { %2465 = vmatprep.subr.bf16.mxu1 %v4305_v29  ;;  %v4381_v29 = vld [vmem:[#allocation5 + $0x890] ss:$28 sps:$4 sm:$0xff]  }
  0x98   :  { %2388 = vmatpush1.bf16.msra.mxu0 %v4306_v32  ;;  %v4392_v32 = vld [vmem:[#allocation5 + $0x46c] ss:$28 sps:$4 sm:$0xff]  }
  0x99   :  { %2466 = vmatpush1.bf16.msra.mxu1 %v4303_v31  ;;  %2389 = vmatprep.subr.bf16.mxu0 %v4314_v34  ;;  %v4389_v31 = vld [vmem:[#allocation5 + $0x85c] ss:$28 sps:$4 sm:$0xff]   ;;  %v4390_v34 = vld [vmem:[#allocation5 + $0x468] ss:$28 sps:$4 sm:$0xff]  }
  0x9a   :  { %2467 = vmatprep.subr.bf16.mxu1 %v4311_v33  ;;  %v4387_v33 = vld [vmem:[#allocation5 + $0x858] ss:$28 sps:$4 sm:$0xff]  }
  0x9c   :  { %2390 = vmatpush1.bf16.msra.mxu0 %v4312_v38  ;;  %v4393_v38 = vld [vmem:[#allocation5 + $0x820] ss:$28 sps:$4 sm:$0xff]  }
  0x9d   :  { %2468 = vmatpush1.bf16.msra.mxu1 %v4309_v37  ;;  %2391 = vmatprep.subr.bf16.mxu0 %v4320_v40  ;;  %v4398_v37 = vld [vmem:[#allocation5 + $0x434] ss:$28 sps:$4 sm:$0xff]   ;;  %v4401_v40 = vld [vmem:[#allocation5 + $0x7ec] ss:$28 sps:$4 sm:$0xff]  }
  0x9e   :  { %2469 = vmatprep.subr.bf16.mxu1 %v4317_v39  ;;  %v4396_v39 = vld [vmem:[#allocation5 + $0x430] ss:$28 sps:$4 sm:$0xff]  }
  0xa0   :  { %2392 = vmatpush1.bf16.msra.mxu0 %v4318_v42  ;;  %v4399_v42 = vld [vmem:[#allocation5 + $0x7e8] ss:$28 sps:$4 sm:$0xff]  }
  0xa1   :  { %2470 = vmatpush1.bf16.msra.mxu1 %v4315_v41  ;;  %2393 = vmatprep.subr.bf16.mxu0 %v4326_v44  ;;  %v4404_v41 = vld [vmem:[#allocation5 + $0x3fc] ss:$28 sps:$4 sm:$0xff]   ;;  %v4407_v44 = vld [vmem:[#allocation5 + $0x7b4] ss:$28 sps:$4 sm:$0xff]  }
  0xa2   :  { %2471 = vmatprep.subr.bf16.mxu1 %v4323_v43  ;;  %v4402_v43 = vld [vmem:[#allocation5 + $0x3f8] ss:$28 sps:$4 sm:$0xff]  }
  0xa4   :  { %2394 = vmatpush2.bf16.msra.mxu0 %v4324_v46  ;;  %v4405_v46 = vld [vmem:[#allocation5 + $0x7b0] ss:$28 sps:$4 sm:$0xff]  }
  0xa5   :  { %2472 = vmatpush1.bf16.msra.mxu1 %v4321_v45  ;;  %2395 = vmatprep.subr.bf16.mxu0 %v4332_v48  ;;  %v4410_v45 = vld [vmem:[#allocation5 + $0x3c4] ss:$28 sps:$4 sm:$0xff]   ;;  %v4413_v48 = vld [vmem:[#allocation5 + $0x77c] ss:$28 sps:$4 sm:$0xff]  }
  0xa6   :  { %2473 = vmatprep.subr.bf16.mxu1 %v4329_v47  ;;  %v4408_v47 = vld [vmem:[#allocation5 + $0x3c0] ss:$28 sps:$4 sm:$0xff]  }
  0xa8   :  { %2396 = vmatpush2.bf16.msra.mxu0 %v4330_v51  ;;  %v4411_v51 = vld [vmem:[#allocation5 + $0x778] ss:$28 sps:$4 sm:$0xff]  }
  0xa9   :  { %2474 = vmatpush1.bf16.msra.mxu1 %v4327_v50  ;;  %2397 = vmatprep.subr.bf16.mxu0 %v4338_v54  ;;  %v4416_v50 = vld [vmem:[#allocation5 + $0x38c] ss:$28 sps:$4 sm:$0xff]   ;;  %v4419_v54 = vld [vmem:[#allocation5 + $0x744] ss:$28 sps:$4 sm:$0xff]  }
  0xaa   :  { %2475 = vmatprep.subr.bf16.mxu1 %v4335_v53  ;;  %v4414_v53 = vld [vmem:[#allocation5 + $0x388] ss:$28 sps:$4 sm:$0xff]  }
  0xac   :  { %2398 = vmatpush2.bf16.msra.mxu0 %v4336_v56  ;;  %v4417_v56 = vld [vmem:[#allocation5 + $0x740] ss:$28 sps:$4 sm:$0xff]  }
  0xad   :  { %2476 = vmatpush2.bf16.msra.mxu1 %v4333_v55  ;;  %2399 = vmatprep.subr.bf16.mxu0 %v4344_v58  ;;  %v4422_v55 = vld [vmem:[#allocation5 + $0x6d4] ss:$28 sps:$4 sm:$0xff]   ;;  %v4425_v58 = vld [vmem:[#allocation5 + $0x70c] ss:$28 sps:$4 sm:$0xff]  }
  0xae   :  { %2477 = vmatprep.subr.bf16.mxu1 %v4341_v57  ;;  %v4420_v57 = vld [vmem:[#allocation5 + $0x6d0] ss:$28 sps:$4 sm:$0xff]  }
  0xb0   :  { %2400 = vmatpush2.bf16.msra.mxu0 %v4342_v60  ;;  %v4423_v60 = vld [vmem:[#allocation5 + $0x708] ss:$28 sps:$4 sm:$0xff]  }
  0xb1   :  { %2478 = vmatpush2.bf16.msra.mxu1 %v4339_v59  ;;  %2401 = vmatprep.subr.bf16.mxu0 %v4350_v62  ;;  %v4428_v59 = vld [vmem:[#allocation5 + $0x69c] ss:$28 sps:$4 sm:$0xff]   ;;  %v4431_v62 = vld [vmem:[#allocation5 + $0xa54] ss:$28 sps:$4 sm:$0xff]  }
  0xb2   :  { %2479 = vmatprep.subr.bf16.mxu1 %v4347_v61  ;;  %v4426_v61 = vld [vmem:[#allocation5 + $0x698] ss:$28 sps:$4 sm:$0xff]  }
  0xb4   :  { %2402 = vmatpush2.bf16.msra.mxu0 %v4348_v0  ;;  %v4429_v0 = vld [vmem:[#allocation5 + $0xa50] ss:$28 sps:$4 sm:$0xff]  }
  0xb5   :  { %2480 = vmatpush2.bf16.msra.mxu1 %v4345_v63  ;;  %2403 = vmatprep.subr.bf16.mxu0 %v4356_v2  ;;  %v4434_v63 = vld [vmem:[#allocation5 + $0x664] ss:$28 sps:$4 sm:$0xff]   ;;  %v4437_v2 = vld [vmem:[#allocation5 + $0xa1c] ss:$28 sps:$4 sm:$0xff]  }
  0xb6   :  { %2481 = vmatprep.subr.bf16.mxu1 %v4353_v1  ;;  %v4432_v1 = vld [vmem:[#allocation5 + $0x660] ss:$28 sps:$4 sm:$0xff]  }
  0xb8   :  { %2404 = vmatpush2.bf16.msra.mxu0 %v4354_v4  ;;  %v4435_v4 = vld [vmem:[#allocation5 + $0xa18] ss:$28 sps:$4 sm:$0xff]  }
  0xb9   :  { %2482 = vmatpush2.bf16.msra.mxu1 %v4351_v3  ;;  %2405 = vmatprep.subr.bf16.mxu0 %v4362_v6  ;;  %v4440_v3 = vld [vmem:[#allocation5 + $0x62c] ss:$28 sps:$4 sm:$0xff]   ;;  %v4443_v6 = vld [vmem:[#allocation5 + $0x9e4] ss:$28 sps:$4 sm:$0xff]  }
  0xba   :  { %2483 = vmatprep.subr.bf16.mxu1 %v4359_v5  ;;  %v4438_v5 = vld [vmem:[#allocation5 + $0x628] ss:$28 sps:$4 sm:$0xff]  }
  0xbc   :  { %2406 = vmatpush2.bf16.msra.mxu0 %v4360_v10  ;;  %v4441_v10 = vld [vmem:[#allocation5 + $0x9e0] ss:$28 sps:$4 sm:$0xff]  }
  0xbd   :  { %2484 = vmatpush2.bf16.msra.mxu1 %v4357_v7  ;;  %2407 = vmatprep.subr.bf16.mxu0 %v4368_v12  ;;  %v4446_v7 = vld [vmem:[#allocation5 + $0x5f4] ss:$28 sps:$4 sm:$0xff]   ;;  %v4449_v12 = vld [vmem:[#allocation5 + $0x9ac] ss:$28 sps:$4 sm:$0xff]  }
  0xbe   :  { %2485 = vmatprep.subr.bf16.mxu1 %v4365_v11  ;;  %v4444_v11 = vld [vmem:[#allocation5 + $0x5f0] ss:$28 sps:$4 sm:$0xff]  }
  0xc0   :  { %2408 = vmatpush2.bf16.msra.mxu0 %v4366_v14  ;;  %v4447_v14 = vld [vmem:[#allocation5 + $0x9a8] ss:$28 sps:$4 sm:$0xff]  }
  0xc1   :  { %2486 = vmatpush2.bf16.msra.mxu1 %v4363_v13  ;;  %2500 = vmatprep.subr.bf16.mxu0 %v4374_v18  ;;  %v4452_v13 = vld [vmem:[#allocation5 + $0x5bc] ss:$28 sps:$4 sm:$0xff]   ;;  %v4458_v18 = vld [vmem:[#allocation5 + $0x584] ss:$28 sps:$4 sm:$0xff]  }
  0xc2   :  { %2487 = vmatprep.subr.bf16.mxu1 %v4371_v15  ;;  %v4450_v15 = vld [vmem:[#allocation5 + $0x5b8] ss:$28 sps:$4 sm:$0xff]  }
  0xc3   :  { %2410 = vmatmul.mubr.bf16.vlgmr.msra.gmra.mxu0 %v4934_v21 }
  0xc4   :  { %2501 = vmatpush1.bf16.msra.mxu0 %v4372_v22  ;;  %2532 = vmatprep.mubr.bf16.mxu0 %v4915_v52  ;;  %v4456_v22 = vld [vmem:[#allocation5 + $0x580] ss:$28 sps:$4 sm:$0xff]  }
  0xc5   :  { %2488 = vmatpush2.bf16.msra.mxu1 %v4369_v20  ;;  %2502 = vmatprep.subr.bf16.mxu0 %v4380_v24  ;;  %v4453_v20 = vld [vmem:[#allocation5 + $0x970] ss:$28 sps:$4 sm:$0xff]  }
  0xc6   :  { %2489 = vmatprep.subr.bf16.mxu1 %v4377_v23  ;;  %v4461_v23 = vld [vmem:[#allocation5 + $0x93c] ss:$28 sps:$4 sm:$0xff]   ;;  %v4464_v24 = vld [vmem:[#allocation5 + $0x54c] ss:$28 sps:$4 sm:$0xff]  }
  0xc8   :  { %2503 = vmatpush1.bf16.msra.mxu0 %v4378_v26  ;;  %v4462_v26 = vld [vmem:[#allocation5 + $0x548] ss:$28 sps:$4 sm:$0xff]  }
  0xc9   :  { %2490 = vmatpush2.bf16.msra.mxu1 %v4375_v25  ;;  %2504 = vmatprep.subr.bf16.mxu0 %v4386_v28  ;;  %v4459_v25 = vld [vmem:[#allocation5 + $0x938] ss:$28 sps:$4 sm:$0xff]  }
  0xca   :  { %2541 = vmatprep.subr.bf16.mxu1 %v4383_v27  ;;  %v4467_v27 = vld [vmem:[#allocation5 + $0x904] ss:$28 sps:$4 sm:$0xff]   ;;  %v4470_v28 = vld [vmem:[#allocation5 + $0x19c] ss:$28 sps:$4 sm:$0xff]  }
  0xcc   :  { %2492 = vmatmul.mubr.bf16.vlgmr.msra.gmra.mxu1 %v4919_v8  ;;  %2505 = vmatpush1.bf16.msra.mxu0 %v4384_v30  ;;  %v4468_v30 = vld [vmem:[#allocation5 + $0x198] ss:$28 sps:$4 sm:$0xff]  }
  0xcd   :  { %2542 = vmatpush1.bf16.msra.mxu1 %v4381_v29  ;;  %2506 = vmatprep.subr.bf16.mxu0 %v4392_v32  ;;  %v4465_v29 = vld [vmem:[#allocation5 + $0x900] ss:$28 sps:$4 sm:$0xff]  }
  0xce   :  { %2543 = vmatprep.subr.bf16.mxu1 %v4389_v31  ;;  %2573 = vmatprep.mubr.bf16.mxu1 %v4931_v36  ;;  %v4473_v31 = vld [vmem:[#allocation5 + $0x8cc] ss:$28 sps:$4 sm:$0xff]   ;;  %v4476_v32 = vld [vmem:[#allocation5 + $0x164] ss:$28 sps:$4 sm:$0xff]  }
  0xd0   :  { %2507 = vmatpush1.bf16.msra.mxu0 %v4390_v34  ;;  %v4474_v34 = vld [vmem:[#allocation5 + $0x160] ss:$28 sps:$4 sm:$0xff]  }
  0xd1   :  { %2544 = vmatpush1.bf16.msra.mxu1 %v4387_v33  ;;  %2508 = vmatprep.subr.bf16.mxu0 %v4398_v37  ;;  %v4471_v33 = vld [vmem:[#allocation5 + $0x8c8] ss:$28 sps:$4 sm:$0xff]  }
  0xd2   :  { %2545 = vmatprep.subr.bf16.mxu1 %v4395_v35  ;;  %v4479_v35 = vld [vmem:[#allocation5 + $0x12c] ss:$28 sps:$4 sm:$0xff]  }
  0xd3   :  { %v4482_v37 = vld [vmem:[#allocation5 + $0xa8c] ss:$28 sps:$4 sm:$0xff]  }
  0xd4   :  { %2509 = vmatpush1.bf16.msra.mxu0 %v4396_v39  ;;  %v4480_v39 = vld [vmem:[#allocation5 + $0xa88] ss:$28 sps:$4 sm:$0xff]  }
  0xd5   :  { %2546 = vmatpush1.bf16.msra.mxu1 %v4393_v38  ;;  %2510 = vmatprep.subr.bf16.mxu0 %v4404_v41  ;;  %v4477_v38 = vld [vmem:[#allocation5 + $0x128] ss:$28 sps:$4 sm:$0xff]   ;;  %v4488_v41 = vld [vmem:[#allocation5 + $0x51c] ss:$28 sps:$4 sm:$0xff]  }
  0xd6   :  { %2547 = vmatprep.subr.bf16.mxu1 %v4401_v40  ;;  %v4485_v40 = vld [vmem:[#allocation5 + $0xf4] ss:$28 sps:$4 sm:$0xff]  }
  0xd8   :  { %2511 = vmatpush1.bf16.msra.mxu0 %v4402_v43  ;;  %v4491_v43 = vld [vmem:[#allocation5 + $0xbc] ss:$28 sps:$4 sm:$0xff]  }
  0xd9   :  { %2548 = vmatpush1.bf16.msra.mxu1 %v4399_v42  ;;  %2512 = vmatprep.subr.bf16.mxu0 %v4410_v45  ;;  %v4483_v42 = vld [vmem:[#allocation5 + $0xf0] ss:$28 sps:$4 sm:$0xff]   ;;  %v4489_v45 = vld [vmem:[#allocation5 + $0xb8] ss:$28 sps:$4 sm:$0xff]  }
  0xda   :  { %2549 = vmatprep.subr.bf16.mxu1 %v4407_v44  ;;  %v4486_v44 = vld [vmem:[#allocation5 + $0x518] ss:$28 sps:$4 sm:$0xff]  }
  0xdc   :  { %2513 = vmatpush1.bf16.msra.mxu0 %v4408_v47  ;;  %v4497_v47 = vld [vmem:[#allocation5 + $0x84] ss:$28 sps:$4 sm:$0xff]  }
  0xdd   :  { %2550 = vmatpush1.bf16.msra.mxu1 %v4405_v46  ;;  %2514 = vmatprep.subr.bf16.mxu0 %v4416_v50  ;;  %v4494_v46 = vld [vmem:[#allocation5 + $0x4e4] ss:$28 sps:$4 sm:$0xff]  }
  0xde   :  { %2551 = vmatprep.subr.bf16.mxu1 %v4413_v48  ;;  %v4492_v48 = vld [vmem:[#allocation5 + $0x4e0] ss:$28 sps:$4 sm:$0xff]  }
  0xdf   :  { %v4495_v50 = vld [vmem:[#allocation5 + $0x80] ss:$28 sps:$4 sm:$0xff]  }
  0xe0   :  { %2515 = vmatpush1.bf16.msra.mxu0 %v4414_v53  ;;  %v4503_v53 = vld [vmem:[#allocation5 + $0x4c] ss:$28 sps:$4 sm:$0xff]  }
  0xe1   :  { %2552 = vmatpush1.bf16.msra.mxu1 %v4411_v51  ;;  %2516 = vmatprep.subr.bf16.mxu0 %v4422_v55  ;;  %v4500_v51 = vld [vmem:[#allocation5 + $0x4ac] ss:$28 sps:$4 sm:$0xff]   ;;  %v492_v55 = vlaneseq }
  0xe2   :  { %2553 = vmatprep.subr.bf16.mxu1 %v4419_v54  ;;  %v4498_v54 = vld [vmem:[#allocation5 + $0x4a8] ss:$28 sps:$4 sm:$0xff]  }
  0xe4   :  { %2517 = vmatpush2.bf16.msra.mxu0 %v4420_v57  ;;  %v4506_v57 = vld [vmem:[#allocation5 + $0x474] ss:$28 sps:$4 sm:$0xff]  }
  0xe5   :  { %2554 = vmatpush1.bf16.msra.mxu1 %v4417_v56  ;;  %2518 = vmatprep.subr.bf16.mxu0 %v4428_v59  ;;  %v4501_v56 = vld [vmem:[#allocation5 + $0x48] ss:$28 sps:$4 sm:$0xff]   ;;  %v4504_v59 = vld [vmem:[#allocation5 + $0x470] ss:$28 sps:$4 sm:$0xff]  }
  0xe6   :  { %2555 = vmatprep.subr.bf16.mxu1 %v4425_v58  ;;  %v4509_v58 = vld [vmem:[#allocation5 + $0x14] ss:$28 sps:$4 sm:$0xff]  }
  0xe8   :  { %2519 = vmatpush2.bf16.msra.mxu0 %v4426_v61  ;;  %v4507_v61 = vld [vmem:[#allocation5 + $0x10] ss:$28 sps:$4 sm:$0xff]  }
  0xe9   :  { %2556 = vmatpush1.bf16.msra.mxu1 %v4423_v60  ;;  %2520 = vmatprep.subr.bf16.mxu0 %v4434_v63  ;;  %v4947_v60 = vshrl.u32 %v492_v55, 7  ;;  %v4515_v63 = vld [vmem:[#allocation5 + $0x35c] ss:$28 sps:$4 sm:$0xff]  }
  0xea   :  { %2557 = vmatprep.subr.bf16.mxu1 %v4431_v62  ;;  %v4512_v62 = vld [vmem:[#allocation5 + $0x43c] ss:$28 sps:$4 sm:$0xff]  }
  0xec   :  { %2521 = vmatpush2.bf16.msra.mxu0 %v4432_v1  ;;  %v4513_v1 = vld [vmem:[#allocation5 + $0x358] ss:$28 sps:$4 sm:$0xff]  }
  0xed   :  { %2558 = vmatpush2.bf16.msra.mxu1 %v4429_v0  ;;  %2522 = vmatprep.subr.bf16.mxu0 %v4440_v3  ;;  %v4510_v0 = vld [vmem:[#allocation5 + $0x438] ss:$28 sps:$4 sm:$0xff]   ;;  %v4521_v3 = vld [vmem:[#allocation5 + $0x324] ss:$28 sps:$4 sm:$0xff]  }
  0xee   :  { %2559 = vmatprep.subr.bf16.mxu1 %v4437_v2  ;;  %v4518_v2 = vld [vmem:[#allocation5 + $0x404] ss:$28 sps:$4 sm:$0xff]  }
  0xf0   :  { %2523 = vmatpush2.bf16.msra.mxu0 %v4438_v5  ;;  %v4519_v5 = vld [vmem:[#allocation5 + $0x320] ss:$28 sps:$4 sm:$0xff]  }
  0xf1   :  { %2560 = vmatpush2.bf16.msra.mxu1 %v4435_v4  ;;  %2524 = vmatprep.subr.bf16.mxu0 %v4446_v7  ;;  %v4516_v4 = vld [vmem:[#allocation5 + $0x400] ss:$28 sps:$4 sm:$0xff]   ;;  %v4527_v7 = vld [vmem:[#allocation5 + $0x2ec] ss:$28 sps:$4 sm:$0xff]  }
  0xf2   :  { %2561 = vmatprep.subr.bf16.mxu1 %v4443_v6  ;;  %v4524_v6 = vld [vmem:[#allocation5 + $0x3cc] ss:$28 sps:$4 sm:$0xff]  }
  0xf4   :  { %2525 = vmatpush2.bf16.msra.mxu0 %v4444_v11  ;;  %v4525_v11 = vld [vmem:[#allocation5 + $0x2e8] ss:$28 sps:$4 sm:$0xff]  }
  0xf5   :  { %2562 = vmatpush2.bf16.msra.mxu1 %v4441_v10  ;;  %2526 = vmatprep.subr.bf16.mxu0 %v4452_v13  ;;  %v4522_v10 = vld [vmem:[#allocation5 + $0x3c8] ss:$28 sps:$4 sm:$0xff]   ;;  %v4533_v13 = vld [vmem:[#allocation5 + $0x2b4] ss:$28 sps:$4 sm:$0xff]  }
  0xf6   :  { %2563 = vmatprep.subr.bf16.mxu1 %v4449_v12  ;;  %v4530_v12 = vld [vmem:[#allocation5 + $0x394] ss:$28 sps:$4 sm:$0xff]  }
  0xf8   :  { %2527 = vmatpush2.bf16.msra.mxu0 %v4450_v15  ;;  %v4531_v15 = vld [vmem:[#allocation5 + $0x2b0] ss:$28 sps:$4 sm:$0xff]  }
  0xf9   :  { %2564 = vmatpush2.bf16.msra.mxu1 %v4447_v14  ;;  %2528 = vmatprep.subr.bf16.mxu0 %v4458_v18  ;;  %v4528_v14 = vld [vmem:[#allocation5 + $0x390] ss:$28 sps:$4 sm:$0xff]   ;;  %v4539_v18 = vld [vmem:[#allocation5 + $0x27c] ss:$28 sps:$4 sm:$0xff]  }
  0xfa   :  { %2565 = vmatprep.subr.bf16.mxu1 %v4455_v17  ;;  %v4536_v17 = vld [vmem:[#allocation5 + $0x6dc] ss:$28 sps:$4 sm:$0xff]  }
  0xfc   :  { %2529 = vmatpush2.bf16.msra.mxu0 %v4456_v22  ;;  %v4537_v22 = vld [vmem:[#allocation5 + $0x278] ss:$28 sps:$4 sm:$0xff]  }
  0xfd   :  { %2566 = vmatpush2.bf16.msra.mxu1 %v4453_v20  ;;  %2530 = vmatprep.subr.bf16.mxu0 %v4464_v24  ;;  %v4534_v20 = vld [vmem:[#allocation5 + $0x6d8] ss:$28 sps:$4 sm:$0xff]   ;;  %v4545_v24 = vld [vmem:[#allocation5 + $0x244] ss:$28 sps:$4 sm:$0xff]  }
  0xfe   :  { %2567 = vmatprep.subr.bf16.mxu1 %v4461_v23  ;;  %v4542_v23 = vld [vmem:[#allocation5 + $0x6a4] ss:$28 sps:$4 sm:$0xff]  }
 0x100   :  { %2531 = vmatpush2.bf16.msra.mxu0 %v4462_v26  ;;  %v4540_v26 = vld [vmem:[#allocation5 + $0x6a0] ss:$28 sps:$4 sm:$0xff]  }
 0x101   :  { %2568 = vmatpush2.bf16.msra.mxu1 %v4459_v25  ;;  %2623 = vmatprep.subr.bf16.mxu0 %v4470_v28  ;;  %v494_v25 = vsub.s32 0, %v4947_v60  ;;  %v4548_v28 = vld [vmem:[#allocation5 + $0x66c] ss:$28 sps:$4 sm:$0xff]  }
 0x102   :  { %2569 = vmatprep.subr.bf16.mxu1 %v4467_v27  ;;  %v4543_v27 = vld [vmem:[#allocation5 + $0x240] ss:$28 sps:$4 sm:$0xff]  }
 0x103   :  { %2533 = vmatmul.mubr.bf16.vlgmr.msra.gmra.mxu0 %v4921_v9 }
 0x104   :  { %2624 = vmatpush1.bf16.msra.mxu0 %v4468_v30  ;;  %2655 = vmatprep.mubr.bf16.mxu0 %v4913_v49  ;;  %v4546_v30 = vld [vmem:[#allocation5 + $0x668] ss:$28 sps:$4 sm:$0xff]  }
 0x105   :  { %2570 = vmatpush2.bf16.msra.mxu1 %v4465_v29  ;;  %2625 = vmatprep.subr.bf16.mxu0 %v4476_v32  ;;  %v4551_v29 = vld [vmem:[#allocation5 + $0x20c] ss:$28 sps:$4 sm:$0xff]   ;;  %v4554_v32 = vld [vmem:[#allocation5 + $0x634] ss:$28 sps:$4 sm:$0xff]  }
 0x106   :  { %2571 = vmatprep.subr.bf16.mxu1 %v4473_v31  ;;  %v4549_v31 = vld [vmem:[#allocation5 + $0x208] ss:$28 sps:$4 sm:$0xff]  }
 0x108   :  { %2626 = vmatpush1.bf16.msra.mxu0 %v4474_v34  ;;  %v4552_v34 = vld [vmem:[#allocation5 + $0x630] ss:$28 sps:$4 sm:$0xff]  }
 0x109   :  { %2572 = vmatpush2.bf16.msra.mxu1 %v4471_v33  ;;  %2627 = vmatprep.subr.bf16.mxu0 %v4479_v35  ;;  %v4557_v33 = vld [vmem:[#allocation5 + $0x1d4] ss:$28 sps:$4 sm:$0xff]  }
 0x10a   :  { %2596 = vmatprep.subr.bf16.mxu1 %v4482_v37  ;;  %v4555_v35 = vld [vmem:[#allocation5 + $0x1d0] ss:$28 sps:$4 sm:$0xff]   ;;  %v4560_v37 = vld [vmem:[#allocation5 + $0x5fc] ss:$28 sps:$4 sm:$0xff]  }
 0x10c   :  { %2574 = vmatmul.mubr.bf16.vlgmr.msra.gmra.mxu1 %v4934_v21  ;;  %2628 = vmatpush1.bf16.msra.mxu0 %v4477_v38  ;;  %v4950_v38 = vld [vmem:[#allocation7] sm:$0xff] }
 0x10d   :  { %2597 = vmatpush1.bf16.msra.mxu1 %v4480_v39  ;;  %2629 = vmatprep.subr.bf16.mxu0 %v4485_v40  ;;  %v498_v39 = vsub.s32 1, %v4947_v60  ;;  %v4563_v40 = vld [vmem:[#allocation5 + $0x89c] ss:$28 sps:$4 sm:$0xff]  }
 0x10e   :  { %2614 = vmatprep.mubr.bf16.mxu1 %v4864_v16  ;;  %2664 = vmatprep.subr.bf16.mxu1 %v4488_v41  ;;  %v4558_v41 = vld [vmem:[#allocation5 + $0x5f8] ss:$28 sps:$4 sm:$0xff]  }
 0x110   :  { %2630 = vmatpush1.bf16.msra.mxu0 %v4483_v42  ;;  %v4561_v42 = vld [vmem:[#allocation5 + $0x898] ss:$28 sps:$4 sm:$0xff]  }
 0x111   :  { %2631 = vmatprep.subr.bf16.mxu0 %v4491_v43  ;;  %v495_v43 = vrot.slane %v4950_v38, %v494_v25  ;;  %v4592_v25 = vld [vmem:[#allocation5 + $0x1a0] ss:$28 sps:$4 sm:$0xff]  }
 0x114   :  { %3938 = vmatmul.mubr.msk.bf16.vlgmr.msra.gmra.mxu1 %vm2291_vm0, %v4926_v19  ;;  %2632 = vmatpush1.bf16.msra.mxu0 %v4489_v45  ;;  %v4569_v45 = vld [vmem:[#allocation5 + $0x864] ss:$28 sps:$4 sm:$0xff]  }
 0x115   :  { %2665 = vmatpush1.bf16.msra.mxu1 %v4486_v44  ;;  %2633 = vmatprep.subr.bf16.mxu0 %v4497_v47  ;;  %v4566_v44 = vld [vmem:[#allocation5 + $0x5c4] ss:$28 sps:$4 sm:$0xff]  }
 0x116   :  { %2666 = vmatprep.subr.bf16.mxu1 %v4494_v46  ;;  %2696 = vmatprep.mubr.bf16.mxu1 %v4915_v52  ;;  %v499_v46 = vrot.slane %v4950_v38, %v498_v39  ;;  %v4564_v47 = vld [vmem:[#allocation5 + $0x5c0] ss:$28 sps:$4 sm:$0xff]  }
 0x117   :  { %v4608_v39 = vld [vmem:[#allocation5 + $0xa20] ss:$28 sps:$4 sm:$0xff]  }
 0x118   :  { %2634 = vmatpush1.bf16.msra.mxu0 %v4495_v50 }
 0x119   :  { %2667 = vmatpush1.bf16.msra.mxu1 %v4492_v48  ;;  %2635 = vmatprep.subr.bf16.mxu0 %v4503_v53 }
 0x11a   :  { %2668 = vmatprep.subr.bf16.mxu1 %v4500_v51  ;;  %v4567_v51 = vld [vmem:[#allocation5 + $0x860] ss:$28 sps:$4 sm:$0xff]  }
 0x11c   :  { %2636 = vmatpush1.bf16.msra.mxu0 %v4501_v56 }
 0x11d   :  { %2669 = vmatpush1.bf16.msra.mxu1 %v4498_v54  ;;  %2637 = vmatprep.subr.bf16.mxu0 %v4509_v58  ;;  %v4572_v54 = vld [vmem:[#allocation5 + $0x58c] ss:$28 sps:$4 sm:$0xff]  }
 0x11e   :  { %2670 = vmatprep.subr.bf16.mxu1 %v4506_v57  ;;  %v4575_v57 = vld [vmem:[#allocation5 + $0x82c] ss:$28 sps:$4 sm:$0xff]  }
 0x120   :  { %2638 = vmatpush1.bf16.msra.mxu0 %v4507_v61  ;;  %v4570_v61 = vld [vmem:[#allocation5 + $0x588] ss:$28 sps:$4 sm:$0xff]  }
 0x121   :  { %2671 = vmatpush1.bf16.msra.mxu1 %v4504_v59  ;;  %2639 = vmatprep.subr.bf16.mxu0 %v4515_v63 }
 0x122   :  { %2672 = vmatprep.subr.bf16.mxu1 %v4512_v62 }
 0x124   :  { %2640 = vmatpush2.bf16.msra.mxu0 %v4513_v1 }
 0x125   :  { %2673 = vmatpush1.bf16.msra.mxu1 %v4510_v0  ;;  %2641 = vmatprep.subr.bf16.mxu0 %v4521_v3  ;;  %v4573_v0 = vld [vmem:[#allocation5 + $0x828] ss:$28 sps:$4 sm:$0xff]  }
 0x126   :  { %2674 = vmatprep.subr.bf16.mxu1 %v4518_v2  ;;  %v4578_v2 = vld [vmem:[#allocation5 + $0x554] ss:$28 sps:$4 sm:$0xff]  }
 0x128   :  { %2642 = vmatpush2.bf16.msra.mxu0 %v4519_v5  ;;  %v4581_v5 = vld [vmem:[#allocation5 + $0x7f4] ss:$28 sps:$4 sm:$0xff]  }
 0x129   :  { %2675 = vmatpush1.bf16.msra.mxu1 %v4516_v4  ;;  %2643 = vmatprep.subr.bf16.mxu0 %v4527_v7 }
 0x12a   :  { %2676 = vmatprep.subr.bf16.mxu1 %v4524_v6  ;;  %v4576_v6 = vld [vmem:[#allocation5 + $0x550] ss:$28 sps:$4 sm:$0xff]  }
 0x12c   :  { %2644 = vmatpush2.bf16.msra.mxu0 %v4525_v11  ;;  %v4584_v11 = vld [vmem:[#allocation5 + $0x7bc] ss:$28 sps:$4 sm:$0xff]  }
 0x12d   :  { %2677 = vmatpush1.bf16.msra.mxu1 %v4522_v10  ;;  %2645 = vmatprep.subr.bf16.mxu0 %v4533_v13  ;;  %v4579_v10 = vld [vmem:[#allocation5 + $0x7f0] ss:$28 sps:$4 sm:$0xff]  }
 0x12e   :  { %2678 = vmatprep.subr.bf16.mxu1 %v4530_v12  ;;  %v4587_v13 = vld [vmem:[#allocation5 + $0xa94] ss:$28 sps:$4 sm:$0xff]  }
 0x130   :  { %2646 = vmatpush2.bf16.msra.mxu0 %v4531_v15  ;;  %v4582_v15 = vld [vmem:[#allocation5 + $0x7b8] ss:$28 sps:$4 sm:$0xff]  }
 0x131   :  { %2679 = vmatpush1.bf16.msra.mxu1 %v4528_v14  ;;  %2647 = vmatprep.subr.bf16.mxu0 %v4539_v18 }
 0x132   :  { %2680 = vmatprep.subr.bf16.mxu1 %v4536_v17  ;;  %v4585_v17 = vld [vmem:[#allocation5 + $0xa90] ss:$28 sps:$4 sm:$0xff]  }
 0x134   :  { %2648 = vmatpush2.bf16.msra.mxu0 %v4537_v22  ;;  %v4588_v22 = vld [vmem:[#allocation5 + $0x780] ss:$28 sps:$4 sm:$0xff]  }
 0x135   :  { %2681 = vmatpush2.bf16.msra.mxu1 %v4534_v20  ;;  %2649 = vmatprep.subr.bf16.mxu0 %v4545_v24  ;;  %v4590_v20 = vld [vmem:[#allocation5 + $0x784] ss:$28 sps:$4 sm:$0xff]   ;;  %v4595_v24 = vld [vmem:[#allocation5 + $0x74c] ss:$28 sps:$4 sm:$0xff]  }
 0x136   :  { %2682 = vmatprep.subr.bf16.mxu1 %v4542_v23  ;;  %v4591_v23 = vld [vmem:[#allocation5 + $0x360] ss:$28 sps:$4 sm:$0xff]  }
 0x138   :  { %2650 = vmatpush2.bf16.msra.mxu0 %v4543_v27  ;;  %v4596_v27 = vld [vmem:[#allocation5 + $0x328] ss:$28 sps:$4 sm:$0xff]  }
 0x139   :  { %2683 = vmatpush2.bf16.msra.mxu1 %v4540_v26  ;;  %2651 = vmatprep.subr.bf16.mxu0 %v4551_v29  ;;  %v4593_v26 = vld [vmem:[#allocation5 + $0x748] ss:$28 sps:$4 sm:$0xff]  }
 0x13a   :  { %2684 = vmatprep.subr.bf16.mxu1 %v4548_v28  ;;  %v4600_v28 = vld [vmem:[#allocation5 + $0x714] ss:$28 sps:$4 sm:$0xff]   ;;  %v4597_v29 = vld [vmem:[#allocation5 + $0x168] ss:$28 sps:$4 sm:$0xff]  }
 0x13c   :  { %2652 = vmatpush2.bf16.msra.mxu0 %v4549_v31  ;;  %v4601_v31 = vld [vmem:[#allocation5 + $0x2f0] ss:$28 sps:$4 sm:$0xff]  }
 0x13d   :  { %2685 = vmatpush2.bf16.msra.mxu1 %v4546_v30  ;;  %2653 = vmatprep.subr.bf16.mxu0 %v4557_v33  ;;  %v4598_v30 = vld [vmem:[#allocation5 + $0x710] ss:$28 sps:$4 sm:$0xff]  }
 0x13e   :  { %2686 = vmatprep.subr.bf16.mxu1 %v4554_v32  ;;  %v4605_v32 = vld [vmem:[#allocation5 + $0xa5c] ss:$28 sps:$4 sm:$0xff]   ;;  %v4602_v33 = vld [vmem:[#allocation5 + $0x130] ss:$28 sps:$4 sm:$0xff]  }
 0x140   :  { %2654 = vmatpush2.bf16.msra.mxu0 %v4555_v35  ;;  %v4610_v35 = vld [vmem:[#allocation5 + $0xa24] ss:$28 sps:$4 sm:$0xff]  }
 0x141   :  { %2687 = vmatpush2.bf16.msra.mxu1 %v4552_v34  ;;  %2705 = vmatprep.subr.bf16.mxu0 %v4563_v40  ;;  %v4606_v34 = vld [vmem:[#allocation5 + $0x2b8] ss:$28 sps:$4 sm:$0xff]   ;;  %v4611_v40 = vld [vmem:[#allocation5 + $0x280] ss:$28 sps:$4 sm:$0xff]  }
 0x142   :  { %2688 = vmatprep.subr.bf16.mxu1 %v4560_v37  ;;  %v4607_v37 = vld [vmem:[#allocation5 + $0xf8] ss:$28 sps:$4 sm:$0xff]  }
 0x143   :  { %v2329_v48 = vpop.f32.mrf.mxu0  ;;  %2656 = vmatmul.mubr.bf16.vlgmr.msra.gmra.mxu0 %v4919_v8 }
 0x144   :  { %v2370_v50 = vpop.f32.mrf.mxu1  ;;  %v2330_v53 = vadd.f32 %v2329_v48, %v495_v43  ;;  %2706 = vmatpush1.bf16.msra.mxu0 %v4561_v42  ;;  %2737 = vmatprep.mubr.bf16.mxu0 %v4931_v36  ;;  %v4612_v42 = vld [vmem:[#allocation5 + $0xc0] ss:$28 sps:$4 sm:$0xff]   ;;  %v4613_v43 = vld [vmem:[#allocation5 + $0x9e8] ss:$28 sps:$4 sm:$0xff]  }
 0x145   :  { %2689 = vmatpush2.bf16.msra.mxu1 %v4558_v41  ;;  %v2331_v55 = vpop.f32.mrf.mxu0  ;;  %2707 = vmatprep.subr.bf16.mxu0 %v4569_v45  ;;  %v4615_v41 = vld [vmem:[#allocation5 + $0x9ec] ss:$28 sps:$4 sm:$0xff]   ;;  %v4625_v48 = vld [vmem:[#allocation5 + $0x97c] ss:$28 sps:$4 sm:$0xff]  }
 0x146   :  { %2690 = vmatprep.subr.bf16.mxu1 %v4566_v44  ;;  %v2372_v56 = vpop.f32.mrf.mxu1  ;;  %v2332_v58 = vadd.f32 %v2331_v55, %v499_v46  ;;  %v4956_v59 = vadd.f32 %v2370_v50, %v2330_v53  ;;  %v4620_v44 = vld [vmem:[#allocation5 + $0x9b4] ss:$28 sps:$4 sm:$0xff]   ;;  %v4617_v45 = vld [vmem:[#allocation5 + $0x88] ss:$28 sps:$4 sm:$0xff]  }
 0x147   :  { %v2333_v62 = vpop.f32.mrf.mxu0  ;;  %v4618_v46 = vld [vmem:[#allocation5 + $0x9b0] ss:$28 sps:$4 sm:$0xff]   ;;  %v4626_v53 = vld [vmem:[#allocation5 + $0x1d8] ss:$28 sps:$4 sm:$0xff]  }
 0x148   :  { %v2374_v63 = vpop.f32.mrf.mxu1  ;;  %v4959_v1 = vadd.f32 %v2372_v56, %v2332_v58  ;;  %2708 = vmatpush1.bf16.msra.mxu0 %v4567_v51  ;;  %v4622_v50 = vld [vmem:[#allocation5 + $0x50] ss:$28 sps:$4 sm:$0xff]   ;;  %v4623_v51 = vld [vmem:[#allocation5 + $0x978] ss:$28 sps:$4 sm:$0xff]   ;;  %v4628_v56 = vld [vmem:[#allocation5 + $0x940] ss:$28 sps:$4 sm:$0xff]  }
 0x149   :  { %2691 = vmatpush2.bf16.msra.mxu1 %v4564_v47  ;;  %v2334_v3 = vpop.f32.mrf.mxu0  ;;  %2709 = vmatprep.subr.bf16.mxu0 %v4575_v57  ;;  %v4621_v47 = vld [vmem:[#allocation5 + $0x210] ss:$28 sps:$4 sm:$0xff]   ;;  %v4627_v55 = vld [vmem:[#allocation5 + $0x18] ss:$28 sps:$4 sm:$0xff]   ;;  %v4631_v57 = vld [vmem:[#allocation5 + $0x6e0] ss:$28 sps:$4 sm:$0xff]  }
 0x14a   :  { %2692 = vmatprep.subr.bf16.mxu1 %v4572_v54  ;;  %v2375_v4 = vpop.f32.mrf.mxu1  ;;  %v4630_v54 = vld [vmem:[#allocation5 + $0x944] ss:$28 sps:$4 sm:$0xff]   ;;  %v4635_v58 = vld [vmem:[#allocation5 + $0x90c] ss:$28 sps:$4 sm:$0xff]  }
 0x14b   :  { %v4633_v62 = vld [vmem:[#allocation5 + $0x908] ss:$28 sps:$4 sm:$0xff]   ;;  %v4638_v3 = vld [vmem:[#allocation5 + $0x8d0] ss:$28 sps:$4 sm:$0xff]  }
 0x14c   :  { %v4961_v7 = vpop.f32.mrf.mxu1  ;;  %2710 = vmatpush1.bf16.msra.mxu0 %v4573_v0  ;;  %v4636_v63 = vld [vmem:[#allocation5 + $0x6a8] ss:$28 sps:$4 sm:$0xff]   ;;  %v4640_v0 = vld [vmem:[#allocation5 + $0x8d4] ss:$28 sps:$4 sm:$0xff]  }
 0x14d   :  { %2693 = vmatpush2.bf16.msra.mxu1 %v4570_v61  ;;  %2711 = vmatprep.subr.bf16.mxu0 %v4581_v5  ;;  %v4632_v61 = vld [vmem:[#allocation5 + $0x520] ss:$28 sps:$4 sm:$0xff]   ;;  %v4641_v4 = vld [vmem:[#allocation5 + $0x670] ss:$28 sps:$4 sm:$0xff]  }
 0x14e   :  { %2694 = vmatprep.subr.bf16.mxu1 %v4578_v2  ;;  %v4963_v12 = vpop.f32.mrf.mxu1  ;;  %v4637_v2 = vld [vmem:[#allocation5 + $0x4e8] ss:$28 sps:$4 sm:$0xff]   ;;  %v4643_v5 = vld [vmem:[#allocation5 + $0xa60] ss:$28 sps:$4 sm:$0xff]  }
 0x150   :  { %v2456_v14 = vpop.f32.mrf.mxu1  ;;  %2712 = vmatpush1.bf16.msra.mxu0 %v4579_v10  ;;  %v4645_v10 = vld [vmem:[#allocation5 + $0x8a0] ss:$28 sps:$4 sm:$0xff]  }
 0x151   :  { %2695 = vmatpush2.bf16.msra.mxu1 %v4576_v6  ;;  %2713 = vmatprep.subr.bf16.mxu0 %v4584_v11  ;;  %v4642_v6 = vld [vmem:[#allocation5 + $0x4b0] ss:$28 sps:$4 sm:$0xff]   ;;  %v4644_v11 = vld [vmem:[#allocation5 + $0x638] ss:$28 sps:$4 sm:$0xff]  }
 0x152   :  { %v2457_v18 = vpop.f32.mrf.mxu1  ;;  %2760 = vmatprep.subr.bf16.mxu1 %v4587_v13  ;;  %v4647_v13 = vld [vmem:[#allocation5 + $0xa28] ss:$28 sps:$4 sm:$0xff]  }
 0x154   :  { %2697 = vmatmul.mubr.bf16.vlgmr.msra.gmra.mxu1 %v4921_v9  ;;  %2714 = vmatpush1.bf16.msra.mxu0 %v4582_v15  ;;  %v4646_v15 = vld [vmem:[#allocation5 + $0x478] ss:$28 sps:$4 sm:$0xff]  }
 0x155   :  { %2761 = vmatpush1.bf16.msra.mxu1 %v4585_v17  ;;  %2715 = vmatprep.subr.bf16.mxu0 %v4590_v20  ;;  %v4649_v17 = vld [vmem:[#allocation5 + $0x868] ss:$28 sps:$4 sm:$0xff]   ;;  %v4651_v20 = vld [vmem:[#allocation5 + $0x9f0] ss:$28 sps:$4 sm:$0xff]  }
 0x156   :  { %2778 = vmatprep.mubr.bf16.mxu1 %v4864_v16  ;;  %3998 = vmatprep.subr.bf16.mxu1 %v4591_v23  ;;  %v4603_v16 = vld [vmem:[#allocation5 + $0xa58] ss:$28 sps:$4 sm:$0xff]  }
 0x158   :  { %2716 = vmatpush1.bf16.msra.mxu0 %v4588_v22 }
 0x159   :  { %2717 = vmatprep.subr.bf16.mxu0 %v4595_v24 }
 0x15c   :  { %3939 = vmatmul.mubr.msk.bf16.vlgmr.msra.gmra.mxu1 %vm2291_vm0, %v4926_v19  ;;  %2718 = vmatpush1.bf16.msra.mxu0 %v4593_v26  ;;  %v4653_v26 = vld [vmem:[#allocation5 + $0x830] ss:$28 sps:$4 sm:$0xff]  }
 0x15d   :  { %3999 = vmatpush3.bf16.msra.mxu1 %v4592_v25  ;;  %2719 = vmatprep.subr.bf16.mxu0 %v4600_v28  ;;  %v4652_v28 = vld [vmem:[#allocation5 + $0x5c8] ss:$28 sps:$4 sm:$0xff]  }
 0x15e   :  { %4000 = vmatprep.subr.bf16.mxu1 %v4596_v27  ;;  %2819 = vmatprep.mubr.bf16.mxu1 %v4913_v49  ;;  %v4616_v49 = vld [vmem:[#allocation5 + $0x248] ss:$28 sps:$4 sm:$0xff]  }
 0x160   :  { %2720 = vmatpush1.bf16.msra.mxu0 %v4598_v30 }
 0x161   :  { %4001 = vmatpush3.bf16.msra.mxu1 %v4597_v29  ;;  %2721 = vmatprep.subr.bf16.mxu0 %v4605_v32  ;;  %v4655_v29 = vld [vmem:[#allocation5 + $0x9b8] ss:$28 sps:$4 sm:$0xff]  }
 0x162   :  { %4002 = vmatprep.subr.bf16.mxu1 %v4601_v31  ;;  %v4659_v31 = vld [vmem:[#allocation5 + $0x980] ss:$28 sps:$4 sm:$0xff]  }
 0x164   :  { %2722 = vmatpush2.bf16.msra.mxu0 %v4603_v16  ;;  %v4661_v16 = vld [vmem:[#allocation5 + $0x7c0] ss:$28 sps:$4 sm:$0xff]  }
 0x165   :  { %4003 = vmatpush3.bf16.msra.mxu1 %v4602_v33  ;;  %2723 = vmatprep.subr.bf16.mxu0 %v4610_v35  ;;  %v4658_v33 = vld [vmem:[#allocation5 + $0x3d0] ss:$28 sps:$4 sm:$0xff]   ;;  %v4660_v35 = vld [vmem:[#allocation5 + $0x558] ss:$28 sps:$4 sm:$0xff]  }
 0x166   :  { %4004 = vmatprep.subr.bf16.mxu1 %v4606_v34 }
 0x168   :  { %2724 = vmatpush2.bf16.msra.mxu0 %v4608_v39  ;;  %v4662_v39 = vld [vmem:[#allocation5 + $0x398] ss:$28 sps:$4 sm:$0xff]  }
 0x169   :  { %4005 = vmatpush3.bf16.msra.mxu1 %v4607_v37  ;;  %2725 = vmatprep.subr.bf16.mxu0 %v4615_v41  ;;  %v4663_v37 = vld [vmem:[#allocation5 + $0x948] ss:$28 sps:$4 sm:$0xff]   ;;  %v4665_v41 = vld [vmem:[#allocation5 + $0x910] ss:$28 sps:$4 sm:$0xff]  }
 0x16a   :  { %4006 = vmatprep.subr.bf16.mxu1 %v4611_v40  ;;  %v4664_v40 = vld [vmem:[#allocation5 + $0x788] ss:$28 sps:$4 sm:$0xff]  }
 0x16c   :  { %2726 = vmatpush2.bf16.msra.mxu0 %v4613_v43  ;;  %v4667_v43 = vld [vmem:[#allocation5 + $0xa98] ss:$28 sps:$4 sm:$0xff]  }
 0x16d   :  { %4007 = vmatpush3.bf16.msra.mxu1 %v4612_v42  ;;  %2727 = vmatprep.subr.bf16.mxu0 %v4620_v44  ;;  %v4666_v42 = vld [vmem:[#allocation5 + $0x750] ss:$28 sps:$4 sm:$0xff]   ;;  %v4668_v44 = vld [vmem:[#allocation5 + $0x8d8] ss:$28 sps:$4 sm:$0xff]  }
 0x16e   :  { %4008 = vmatprep.subr.bf16.mxu1 %v4616_v49  ;;  %v4865_v49 = vmov 0.0  }
 0x170   :  { %2728 = vmatpush2.bf16.msra.mxu0 %v4618_v46  ;;  %v4670_v46 = vld [vmem:[#allocation5 + $0x718] ss:$28 sps:$4 sm:$0xff]  }
 0x171   :  { %4009 = vmatpush3.bf16.msra.mxu1 %v4617_v45  ;;  %2729 = vmatprep.subr.bf16.mxu0 %v4625_v48  ;;  %v4669_v45 = vld [vmem:[#allocation8 + $0x78] sm:$0xff]  }
 0x172   :  { %4010 = vmatprep.subr.bf16.mxu1 %v4621_v47  ;;  %v4686_v47 = vld [vmem:[#allocation8 + $0xf8] sm:$0xff]  }
 0x174   :  { %2730 = vmatpush2.bf16.msra.mxu0 %v4623_v51  ;;  %v4672_v51 = vld [vmem:[#allocation8 + $0x70] sm:$0xff]  }
 0x175   :  { %4011 = vmatpush3.bf16.msra.mxu1 %v4622_v50  ;;  %2731 = vmatprep.subr.bf16.mxu0 %v4630_v54  ;;  %v4671_v50 = vld [vmem:[#allocation8 + $0x38] sm:$0xff]  }
 0x176   :  { %4012 = vmatprep.subr.bf16.mxu1 %v4626_v53  ;;  %v4687_v53 = vld [vmem:[#allocation8 + $0xb8] sm:$0xff]  }
 0x178   :  { %2732 = vmatpush2.bf16.msra.mxu0 %v4628_v56  ;;  %v4674_v56 = vld [vmem:[#allocation8 + $0x68] sm:$0xff]  }
 0x179   :  { %4013 = vmatpush3.bf16.msra.mxu1 %v4627_v55  ;;  %2733 = vmatprep.subr.bf16.mxu0 %v4635_v58  ;;  %v4688_v55 = vld [vmem:[#allocation8 + $0xf0] sm:$0xff]   ;;  %v4690_v58 = vld [vmem:[#allocation8 + $0xe8] sm:$0xff]  }
 0x17a   :  { %4020 = vmatprep.subr.bf16.mxu1 %v4631_v57  ;;  %v4689_v57 = vld [vmem:[#allocation8 + $0xb0] sm:$0xff]  }
 0x17c   :  { %2820 = vmatmul.mubr.bf16.vlgmr.msra.gmra.mxu1 %v4919_v8  ;;  %2734 = vmatpush2.bf16.msra.mxu0 %v4633_v62  ;;  %v4676_v62 = vld [vmem:[#allocation8 + $0x60] sm:$0xff]  }
 0x17d   :  { %4021 = vmatpush3.bf16.msra.mxu1 %v4632_v61  ;;  %2735 = vmatprep.subr.bf16.mxu0 %v4640_v0  ;;  %v4675_v61 = vld [vmem:[#allocation8 + $0x28] sm:$0xff]   ;;  %v4692_v0 = vld [vmem:[#allocation8 + $0xe0] sm:$0xff]  }
 0x17e   :  { %4022 = vmatprep.subr.bf16.mxu1 %v4636_v63  ;;  %2859 = vmatprep.mubr.bf16.mxu1 %v4915_v52  ;;  %v4648_v52 = vld [vmem:[#allocation5 + $0x600] ss:$28 sps:$4 sm:$0xff]   ;;  %v4691_v63 = vld [vmem:[#allocation8 + $0xa8] sm:$0xff]  }
 0x180   :  { %2736 = vmatpush2.bf16.msra.mxu0 %v4638_v3  ;;  %v4694_v3 = vld [vmem:[#allocation8 + $0xd8] sm:$0xff]  }
 0x181   :  { %4023 = vmatpush3.bf16.msra.mxu1 %v4637_v2  ;;  %4042 = vmatprep.subr.bf16.mxu0 %v4643_v5  ;;  %v4693_v2 = vld [vmem:[#allocation8 + $0xa0] sm:$0xff]   ;;  %v4680_v5 = vld [vmem:[#allocation8 + $0x50] sm:$0xff]  }
 0x182   :  { %4024 = vmatprep.subr.bf16.mxu1 %v4641_v4  ;;  %v4679_v4 = vld [vmem:[#allocation8 + $0x18] sm:$0xff]  }
 0x183   :  { %v2411_v14 = vpop.f32.mrf.mxu0  ;;  %2738 = vmatmul.mubr.bf16.vlgmr.msra.gmra.mxu0 %v4934_v21 }
 0x184   :  { %v2412_v8 = vadd.f32 %v2411_v14, %v4956_v59  ;;  %4043 = vmatpush3.bf16.msra.mxu0 %v4645_v10  ;;  %2899 = vmatprep.mubr.bf16.mxu0 %v4931_v36  ;;  %v4650_v59 = vld [vmem:[#allocation5 + $0x440] ss:$28 sps:$4 sm:$0xff]   ;;  %v4696_v10 = vld [vmem:[#allocation8 + $0xd0] sm:$0xff]  }
 0x185   :  { %4025 = vmatpush3.bf16.msra.mxu1 %v4642_v6  ;;  %v2413_v18 = vpop.f32.mrf.mxu0  ;;  %4044 = vmatprep.subr.bf16.mxu0 %v4647_v13  ;;  %v4695_v6 = vld [vmem:[#allocation8 + $0x98] sm:$0xff]   ;;  %v4682_v13 = vld [vmem:[#allocation8 + $0x48] sm:$0xff]   ;;  %v4697_v14 = vld [vmem:[#allocation8 + $0x90] sm:$0xff]  }
 0x186   :  { %4026 = vmatprep.subr.bf16.mxu1 %v4644_v11  ;;  %v4975_v22 = vadd.f32 %v4961_v7, %v2412_v8  ;;  %v2414_v23 = vadd.f32 %v2413_v18, %v4959_v1  ;;  %v4654_v7 = vld [vmem:[#allocation5 + $0x408] ss:$28 sps:$4 sm:$0xff]   ;;  %v4657_v1 = vld [vmem:[#allocation5 + $0x7f8] ss:$28 sps:$4 sm:$0xff]  }
 0x187   :  { %v2415_v24 = vpop.f32.mrf.mxu0  ;;  %v4681_v11 = vld [vmem:[#allocation8 + $0x10] sm:$0xff]   ;;  %v4698_v8 = vld [vmem:[#allocation8 + $0xc8] sm:$0xff]  }
 0x188   :  { %v2455_v25 = vadd.f32 %v4963_v12, %v2414_v23  ;;  %4045 = vmatpush3.bf16.msra.mxu0 %v4649_v17  ;;  %v4656_v12 = vld [vmem:[#allocation5 + $0x590] ss:$28 sps:$4 sm:$0xff]   ;;  %v4684_v17 = vld [vmem:[#allocation8 + $0x40] sm:$0xff]   ;;  %v2947_v23 = vmax.f32 %v4975_v22, 0.0 }
 0x189   :  { %4027 = vmatpush3.bf16.msra.mxu1 %v4646_v15  ;;  %v2416_v27 = vpop.f32.mrf.mxu0  ;;  %4046 = vmatprep.subr.bf16.mxu0 %v4651_v20  ;;  %v4683_v15 = vld [vmem:[#allocation8 + $0x8] sm:$0xff]   ;;  %v4685_v20 = vld [vmem:[#allocation8] sm:$0xff]  }
 0x18a   :  { %4028 = vmatprep.subr.bf16.mxu1 %v4648_v52  ;;  %v2948_v48 = vmax.f32 %v2455_v25, 0.0  ;;  %v4699_v18 = vld [vmem:[#allocation8 + $0x88] sm:$0xff]   ;;  %v4700_v52 = vld [vmem:[#allocation8 + $0xc0] sm:$0xff]   ;;  %v4702_v25 = vld [vmem:[#allocation8 + $0x178] sm:$0xff]  }
 0x18b   :  { %v4701_v24 = vld [vmem:[#allocation8 + $0x80] sm:$0xff]   ;;  %v4704_v27 = vld [vmem:[#allocation8 + $0x170] sm:$0xff]   ;;  %v4706_v22 = vld [vmem:[#allocation8 + $0x168] sm:$0xff]  }
 0x18c   :  { %v4980_v30 = vpop.f32.mrf.mxu1  ;;  %4047 = vmatpush3.bf16.msra.mxu0 %v4653_v26  ;;  %v2955_v54 = vpack.c.bf16 %v2948_v48, %v2948_v48  ;;  %v2954_v26 = vpack.c.bf16 %v2947_v23, %v2947_v23  ;;  %v4712_v48 = vld [vmem:[#allocation8 + $0x150] sm:$0xff]  }
 0x18d   :  { %4029 = vmatpush3.bf16.msra.mxu1 %v4650_v59  ;;  %4048 = vmatprep.subr.bf16.mxu0 %v4655_v29  ;;  %v4703_v59 = vld [vmem:[#allocation8 + $0x138] sm:$0xff]   ;;  %v4705_v29 = vld [vmem:[#allocation8 + $0x130] sm:$0xff]  }
 0x18e   :  { %4030 = vmatprep.subr.bf16.mxu1 %v4652_v28  ;;  %v4982_v36 = vpop.f32.mrf.mxu1 }
 0x190   :  { %v2497_v32 = vpop.f32.mrf.mxu1  ;;  %4049 = vmatpush3.bf16.msra.mxu0 %v4657_v1  ;;  %v502_v1 = vsub.s32 2, %v4947_v60 }
 0x191   :  { %4031 = vmatpush3.bf16.msra.mxu1 %v4654_v7  ;;  %4050 = vmatprep.subr.bf16.mxu0 %v4659_v31  ;;  %v506_v31 = vsub.s32 3, %v4947_v60  ;;  %v4707_v32 = vld [vmem:[#allocation8 + $0x128] sm:$0xff]  }
 0x192   :  { %4032 = vmatprep.subr.bf16.mxu1 %v4656_v12  ;;  %v2498_v34 = vpop.f32.mrf.mxu1 }
 0x193   :  { %v503_v34 = vrot.slane %v4950_v38, %v502_v1  ;;  %v4726_v1 = vld [vmem:[#allocation7] sm:$0xff] }
 0x194   :  { %4051 = vmatpush3.bf16.msra.mxu0 %v4661_v16  ;;  %v4708_v16 = vld [vmem:[#allocation8 + $0x160] sm:$0xff]  }
 0x195   :  { %4033 = vmatpush3.bf16.msra.mxu1 %v4658_v33  ;;  %4052 = vmatprep.subr.bf16.mxu0 %v4663_v37  ;;  %v507_v37 = vrot.slane %v4950_v38, %v506_v31 }
 0x196   :  { %4034 = vmatprep.subr.bf16.mxu1 %v4660_v35 }
 0x198   :  { %4053 = vmatpush3.bf16.msra.mxu0 %v4664_v40 }
 0x199   :  { %4035 = vmatpush3.bf16.msra.mxu1 %v4662_v39  ;;  %4054 = vmatprep.subr.bf16.mxu0 %v4665_v41  ;;  %v4709_v39 = vld [vmem:[#allocation8 + $0x120] sm:$0xff]   ;;  %v4710_v41 = vld [vmem:[#allocation8 + $0x158] sm:$0xff]  }
 0x19a   :  { %4141 = vmatprep.subr.bf16.mxu1 %v4865_v49 }
 0x19c   :  { %2860 = vmatmul.mubr.bf16.vlgmr.msra.gmra.mxu1 %v4921_v9  ;;  %4055 = vmatpush3.bf16.msra.mxu0 %v4666_v42  ;;  %v4673_v9 = vld [vmem:[#allocation8 + $0x30] sm:$0xff]   ;;  %v2494_v42 = vadd.f32 %v4980_v30, %v503_v34 }
 0x19d   :  { %4142 = vmatpush3.bf16.msra.mxu1 %v4667_v43  ;;  %4056 = vmatprep.subr.bf16.mxu0 %v4668_v44  ;;  %v2496_v44 = vadd.f32 %v4982_v36, %v507_v37 }
 0x19e   :  { %4143 = vmatprep.mubr.msk.bf16.mxu1 %vm4866_vm1, %v4865_v49  ;;  %4066 = vmatprep.subr.bf16.mxu1 %v4669_v45 }
 0x1a0   :  { %4057 = vmatpush3.bf16.msra.mxu0 %v4670_v46  ;;  %v4711_v46 = vld [vmem:[#allocation8 + $0x118] sm:$0xff]  }
 0x1a1   :  { %4088 = vmatprep.subr.bf16.mxu0 %v4686_v47 }
 0x1a3   :  { %2900 = vmatmul.mubr.bf16.vlgmr.msra.gmra.mxu0 %v4934_v21  ;;  %v4678_v21 = vld [vmem:[#allocation8 + $0x58] sm:$0xff]  }
 0x1a4   :  { %4144 = vmatmul.mubr.msk.bf16.vlgmr.msra.gmra.mxu1 %vm2291_vm0, %v4926_v19  ;;  %4089 = vmatpush3.bf16.msra.mxu0 %v4687_v53  ;;  %v4677_v19 = vld [vmem:[#allocation8 + $0x20] sm:$0xff]  }
 0x1a5   :  { %4067 = vmatpush3.bf16.msra.mxu1 %v4671_v50  ;;  %3448 = vmatprep.mubr.bf16.mxu1 %v2955_v54 }
 0x1a6   :  { %4068 = vmatprep.subr.bf16.mxu1 %v4672_v51  ;;  %4090 = vmatprep.subr.bf16.mxu0 %v4688_v55 }
 0x1a8   :  { %4091 = vmatpush3.bf16.msra.mxu0 %v4689_v57  ;;  %v4714_v57 = vld [vmem:[#allocation8 + $0x148] sm:$0xff]  }
 0x1a9   :  { %4069 = vmatpush3.bf16.msra.mxu1 %v4673_v9  ;;  %4092 = vmatprep.subr.bf16.mxu0 %v4690_v58  ;;  %v4713_v9 = vld [vmem:[#allocation8 + $0x110] sm:$0xff]  }
 0x1aa   :  { %4070 = vmatprep.subr.bf16.mxu1 %v4674_v56 }
 0x1ac   :  { %4093 = vmatpush3.bf16.msra.mxu0 %v4691_v63 }
 0x1ad   :  { %4071 = vmatpush3.bf16.msra.mxu1 %v4675_v61  ;;  %4094 = vmatprep.subr.bf16.mxu0 %v4692_v0  ;;  %v4716_v0 = vld [vmem:[#allocation8 + $0x140] sm:$0xff]  }
 0x1ae   :  { %4072 = vmatprep.subr.bf16.mxu1 %v4676_v62  ;;  %v4715_v62 = vld [vmem:[#allocation8 + $0x108] sm:$0xff]  }
 0x1b0   :  { %4095 = vmatpush3.bf16.msra.mxu0 %v4693_v2 }
 0x1b1   :  { %4073 = vmatpush3.bf16.msra.mxu1 %v4677_v19  ;;  %4096 = vmatprep.subr.bf16.mxu0 %v4694_v3  ;;  %v4717_v3 = vld [vmem:[#allocation8 + $0x100] sm:$0xff]  }
 0x1b2   :  { %4074 = vmatprep.subr.bf16.mxu1 %v4678_v21  ;;  %v4718_v21 = vld [vmem:[#allocation8 + $0x1b8] sm:$0xff]  }
 0x1b4   :  { %4097 = vmatpush3.bf16.msra.mxu0 %v4695_v6  ;;  %v4721_v6 = vld [vmem:[#allocation8 + $0x1a0] sm:$0xff]  }
 0x1b5   :  { %4075 = vmatpush3.bf16.msra.mxu1 %v4679_v4  ;;  %4098 = vmatprep.subr.bf16.mxu0 %v4696_v10  ;;  %v4719_v4 = vld [vmem:[#allocation8 + $0x1b0] sm:$0xff]   ;;  %v4722_v10 = vld [vmem:[#allocation8 + $0x198] sm:$0xff]  }
 0x1b6   :  { %4076 = vmatprep.subr.bf16.mxu1 %v4680_v5  ;;  %v4720_v5 = vld [vmem:[#allocation8 + $0x1a8] sm:$0xff]  }
 0x1b8   :  { %4099 = vmatpush3.bf16.msra.mxu0 %v4697_v14  ;;  %v4725_v14 = vld [vmem:[#allocation8 + $0x180] sm:$0xff]  }
 0x1b9   :  { %4077 = vmatpush3.bf16.msra.mxu1 %v4681_v11  ;;  %4100 = vmatprep.subr.bf16.mxu0 %v4698_v8  ;;  %v4723_v11 = vld [vmem:[#allocation8 + $0x190] sm:$0xff]  }
 0x1ba   :  { %4078 = vmatprep.subr.bf16.mxu1 %v4682_v13  ;;  %v4724_v13 = vld [vmem:[#allocation8 + $0x188] sm:$0xff]  }
 0x1bc   :  { %4101 = vmatpush3.bf16.msra.mxu0 %v4699_v18 }
 0x1bd   :  { %4079 = vmatpush3.bf16.msra.mxu1 %v4683_v15  ;;  %4102 = vmatprep.subr.bf16.mxu0 %v4700_v52 }
 0x1be   :  { %4080 = vmatprep.subr.bf16.mxu1 %v4684_v17 }
 0x1c0   :  { %4103 = vmatpush3.bf16.msra.mxu0 %v4701_v24 }
 0x1c1   :  { %4081 = vmatpush3.bf16.msra.mxu1 %v4685_v20  ;;  %4147 = vmatprep.subr.bf16.mxu0 %v4865_v49 }
 0x1c2   :  { %4110 = vmatprep.subr.bf16.mxu1 %v4702_v25 }
 0x1c3   :  { %v2534_v28 = vpop.f32.mrf.mxu0 }
 0x1c4   :  { %3449 = vmatmul.mubr.bf16.vlgmr.msra.gmra.mxu1 %v2954_v26  ;;  %v2535_v45 = vadd.f32 %v2534_v28, %v2494_v42  ;;  %v510_v28 = vsub.s32 4, %v4947_v60 }
 0x1c5   :  { %4111 = vmatpush3.bf16.msra.mxu1 %v4703_v59  ;;  %v2536_v7 = vpop.f32.mrf.mxu0 }
 0x1c6   :  { %4112 = vmatprep.subr.bf16.mxu1 %v4704_v27  ;;  %v2537_v50 = vadd.f32 %v2536_v7, %v2496_v44 }
 0x1c7   :  { %v2538_v12 = vpop.f32.mrf.mxu0 }
 0x1c9   :  { %4113 = vmatpush3.bf16.msra.mxu1 %v4705_v29  ;;  %v2539_v33 = vpop.f32.mrf.mxu0  ;;  %v514_v29 = vsub.s32 5, %v4947_v60 }
 0x1ca   :  { %4114 = vmatprep.subr.bf16.mxu1 %v4706_v22 }
 0x1cb   :  { %v515_v12 = vrot.slane %v4726_v1, %v514_v29 }
 0x1cc   :  { %v2575_v35 = vpop.f32.mrf.mxu1 }
 0x1cd   :  { %4115 = vmatpush3.bf16.msra.mxu1 %v4707_v32  ;;  %v2576_v51 = vadd.f32 %v2575_v35, %v2535_v45 }
 0x1ce   :  { %v2577_v40 = vpop.f32.mrf.mxu1  ;;  %4116 = vmatprep.subr.bf16.mxu1 %v4708_v16 }
 0x1cf   :  { %v2578_v54 = vadd.f32 %v2577_v40, %v2537_v50 }
 0x1d0   :  { %v2579_v43 = vpop.f32.mrf.mxu1 }
 0x1d1   :  { %4117 = vmatpush3.bf16.msra.mxu1 %v4709_v39 }
 0x1d2   :  { %v2580_v47 = vpop.f32.mrf.mxu1  ;;  %4118 = vmatprep.subr.bf16.mxu1 %v4710_v41 }
 0x1d4   :  { %v2616_v53 = vpop.f32.mrf.mxu1 }
 0x1d5   :  { %v2617_v55 = vadd.f32 %v2616_v53, %v2576_v51  ;;  %4119 = vmatpush3.bf16.msra.mxu1 %v4711_v46  ;;  %v518_v51 = vsub.s32 6, %v4947_v60 }
 0x1d6   :  { %v2618_v56 = vpop.f32.mrf.mxu1  ;;  %4120 = vmatprep.subr.bf16.mxu1 %v4712_v48 }
 0x1d7   :  { %v2619_v30 = vadd.f32 %v2618_v56, %v2578_v54  ;;  %v2949_v58 = vmax.f32 %v2617_v55, 0.0  ;;  %v519_v55 = vrot.slane %v4726_v1, %v518_v51 }
 0x1d8   :  { %v2620_v61 = vpop.f32.mrf.mxu1 }
 0x1d9   :  { %v2950_v36 = vmax.f32 %v2619_v30, 0.0  ;;  %4121 = vmatpush3.bf16.msra.mxu1 %v4713_v9  ;;  %v2956_v2 = vpack.c.bf16 %v2949_v58, %v2949_v58 }
 0x1da   :  { %v2621_v63 = vpop.f32.mrf.mxu1  ;;  %4122 = vmatprep.subr.bf16.mxu1 %v4714_v57 }
 0x1db   :  { %v2957_v19 = vpack.c.bf16 %v2950_v36, %v2950_v36 }
 0x1dd   :  { %3488 = vmatprep.mubr.bf16.mxu0 %v2957_v19  ;;  %4123 = vmatpush3.bf16.msra.mxu1 %v4715_v62 }
 0x1de   :  { %3489 = vmatmul.mubr.bf16.vlgmr.msra.gmra.mxu0 %v2956_v2  ;;  %4124 = vmatprep.subr.bf16.mxu1 %v4716_v0 }
 0x1df   :  { %4148 = vmatpush3.bf16.msra.mxu0 %v4718_v21  ;;  %4163 = vmatprep.mubr.msk.bf16.mxu0 %vm4866_vm1, %v4865_v49 }
 0x1e0   :  { %4149 = vmatprep.subr.bf16.mxu0 %v4865_v49 }
 0x1e1   :  { %4125 = vmatpush3.bf16.msra.mxu1 %v4717_v3 }
 0x1e3   :  { %4150 = vmatpush3.bf16.msra.mxu0 %v4719_v4 }
 0x1e4   :  { %4151 = vmatprep.subr.bf16.mxu0 %v4865_v49 }
 0x1e7   :  { %4152 = vmatpush3.bf16.msra.mxu0 %v4720_v5 }
 0x1e8   :  { %4153 = vmatprep.subr.bf16.mxu0 %v4865_v49 }
 0x1eb   :  { %4154 = vmatpush3.bf16.msra.mxu0 %v4721_v6 }
 0x1ec   :  { %4155 = vmatprep.subr.bf16.mxu0 %v4865_v49 }
 0x1ef   :  { %4156 = vmatpush3.bf16.msra.mxu0 %v4722_v10 }
 0x1f0   :  { %4157 = vmatprep.subr.bf16.mxu0 %v4865_v49 }
 0x1f3   :  { %4158 = vmatpush3.bf16.msra.mxu0 %v4723_v11 }
 0x1f4   :  { %4159 = vmatprep.subr.bf16.mxu0 %v4865_v49 }
 0x1f7   :  { %4160 = vmatpush3.bf16.msra.mxu0 %v4724_v13 }
 0x1f8   :  { %4161 = vmatprep.subr.bf16.mxu0 %v4865_v49  ;;  %v511_v49 = vrot.slane %v4950_v38, %v510_v28 }
 0x1fb   :  { %4162 = vmatpush3.bf16.msra.mxu0 %v4725_v14 }
 0x203   :  { %v2657_v8 = vpop.f32.mrf.mxu0 }
 0x204   :  { %v2658_v32 = vadd.f32 %v2657_v8, %v511_v49 }
 0x205   :  { %v2659_v15 = vpop.f32.mrf.mxu0 }
 0x206   :  { %v2660_v16 = vadd.f32 %v2659_v15, %v515_v12  ;;  %v3941_v15 = vld [vmem:[#allocation10] ss:$0 sm:$0xff] }
 0x207   :  { %v2661_v17 = vpop.f32.mrf.mxu0 }
 0x209   :  { %v2662_v18 = vpop.f32.mrf.mxu0 }
 0x214   :  { %v2698_v52 = vpop.f32.mrf.mxu1 }
 0x215   :  { %v2699_v34 = vadd.f32 %v2698_v52, %v2658_v32 }
 0x216   :  { %v2700_v20 = vpop.f32.mrf.mxu1 }
 0x217   :  { %v2701_v37 = vadd.f32 %v2700_v20, %v2660_v16 }
 0x218   :  { %v2702_v23 = vpop.f32.mrf.mxu1 }
 0x21a   :  { %v2703_v24 = vpop.f32.mrf.mxu1 }
 0x21c   :  { %v2780_v25 = vpop.f32.mrf.mxu1 }
 0x21e   :  { %v2782_v59 = vpop.f32.mrf.mxu1 }
 0x220   :  { %v2784_v26 = vpop.f32.mrf.mxu1 }
 0x222   :  { %v2785_v27 = vpop.f32.mrf.mxu1 }
 0x23c   :  { %v4014_v7 = vpop.f32.mrf.mxu1 }
 0x23e   :  { %v4015_v22 = vpop.f32.mrf.mxu1 }
 0x23f   :  { %v4016_v9 = vadd.f32 %v4015_v22, %v4014_v7 }
 0x240   :  { %v4017_v31 = vpop.f32.mrf.mxu1 }
 0x241   :  { %v2822_v61 = vadd.f32 %v4016_v9, %v519_v55 }
 0x242   :  { %v4018_v33 = vpop.f32.mrf.mxu1 }
 0x243   :  { %v2739_v35 = vpop.f32.mrf.mxu0 }
 0x244   :  { %v2740_v39 = vadd.f32 %v2739_v35, %v2699_v34 }
 0x245   :  { %v2741_v40 = vpop.f32.mrf.mxu0 }
 0x246   :  { %v2781_v41 = vadd.f32 %v2780_v25, %v2740_v39  ;;  %v2742_v42 = vadd.f32 %v2741_v40, %v2701_v37 }
 0x247   :  { %v2743_v43 = vpop.f32.mrf.mxu0 }
 0x248   :  { %v2783_v44 = vadd.f32 %v2782_v59, %v2742_v42  ;;  %v2951_v45 = vmax.f32 %v2781_v41, 0.0 }
 0x249   :  { %v2744_v46 = vpop.f32.mrf.mxu0 }
 0x24a   :  { %v2952_v47 = vmax.f32 %v2783_v44, 0.0  ;;  %v2958_v48 = vpack.c.bf16 %v2951_v45, %v2951_v45 }
 0x24c   :  { %v2959_v38 = vpack.c.bf16 %v2952_v47, %v2952_v47 }
 0x24e   :  { %3528 = vmatprep.mubr.bf16.mxu1 %v2959_v38 }
 0x24f   :  { %3529 = vmatmul.mubr.bf16.vlgmr.msra.gmra.mxu1 %v2958_v48 }
 0x25c   :  { %v4036_v50 = vpop.f32.mrf.mxu1 }
 0x25e   :  { %v4037_v53 = vpop.f32.mrf.mxu1 }
 0x25f   :  { %v4038_v57 = vadd.f32 %v4037_v53, %v4036_v50 }
 0x260   :  { %v4039_v54 = vpop.f32.mrf.mxu1 }
 0x261   :  { %v2862_v63 = vadd.f32 %v4038_v57, %v2822_v61 }
 0x262   :  { %v4040_v56 = vpop.f32.mrf.mxu1 }
 0x263   :  { %v4058_v30 = vpop.f32.mrf.mxu0 }
 0x264   :  { %v2941_v58 = vpop.f32.mrf.mxu1 }
 0x265   :  { %v4059_v36 = vpop.f32.mrf.mxu0 }
 0x266   :  { %v4145_v62 = vpop.f32.mrf.mxu1  ;;  %v4060_v0 = vadd.f32 %v4059_v36, %v4058_v30 }
 0x267   :  { %v4061_v19 = vpop.f32.mrf.mxu0 }
 0x268   :  { %v2944_v21 = vpop.f32.mrf.mxu1  ;;  %v2902_v2 = vadd.f32 %v4060_v0, %v2862_v63 }
 0x269   :  { %v4062_v3 = vpop.f32.mrf.mxu0 }
 0x26a   :  { %v4146_v4 = vpop.f32.mrf.mxu1  ;;  %v2942_v5 = vadd.f32 %v2941_v58, %v2902_v2 }
 0x26c   :  { %v2953_v60 = vmax.f32 %v2942_v5, 0.0 }
 0x26e   :  { %v2960_v6 = vpack.c.bf16 %v2953_v60, %v2953_v60 }
 0x270   :  { %4164 = vmatmul.mubr.bf16.vlgmr.msra.gmra.mxu0 %v2960_v6 }
 0x284   :  { %v4082_v10 = vpop.f32.mrf.mxu1 }
 0x286   :  { %v4083_v11 = vpop.f32.mrf.mxu1 }
 0x287   :  { %v4084_v13 = vadd.f32 %v4083_v11, %v4082_v10 }
 0x288   :  { %v4085_v14 = vpop.f32.mrf.mxu1 }
 0x289   :  { %v3451_v52 = vadd.f32 %v4084_v13, %v3941_v15 }
 0x28a   :  { %v4086_v8 = vpop.f32.mrf.mxu1 }
 0x29e   :  { %v4104_v17 = vpop.f32.mrf.mxu0 }
 0x2a0   :  { %v4105_v18 = vpop.f32.mrf.mxu0 }
 0x2a1   :  { %v4106_v20 = vadd.f32 %v4105_v18, %v4104_v17 }
 0x2a2   :  { %v4107_v23 = vpop.f32.mrf.mxu0 }
 0x2a3   :  { %v3491_v24 = vadd.f32 %v4106_v20, %v3451_v52 }
 0x2a4   :  { %v4108_v25 = vpop.f32.mrf.mxu0 }
 0x30f   :  { %v4126_v59 = vpop.f32.mrf.mxu1 }
 0x311   :  { %v4127_v26 = vpop.f32.mrf.mxu1 }
 0x312   :  { %v4128_v29 = vadd.f32 %v4127_v26, %v4126_v59 }
 0x313   :  { %v4129_v27 = vpop.f32.mrf.mxu1 }
 0x314   :  { %v3531_v7 = vadd.f32 %v4128_v29, %v3491_v24 }
 0x315   :  { %v4130_v28 = vpop.f32.mrf.mxu1 }
 0x330   :  { %v3570_v49 = vpop.f32.mrf.mxu0 }
 0x331   :  { %v3571_v22 = vadd.f32 %v3570_v49, %v3531_v7 }
 0x332   :  { %v4165_v1 = vpop.f32.mrf.mxu0 }
 0x333   :  { %3576 = vst [vmem:[#allocation11] sm:$0xff] %v3571_v22 }
 0x334   :  { %v3573_v12 = vpop.f32.mrf.mxu0 }
 0x335   :  { %4838 = shalt.err (!%p4835_p1)
}
 0x336   :  { %3586 = dma.vmem_to_hbm [thread:$0]  %s3584_s4, 128, %s5020_s5, [#allocation4]   ;;  %v4166_v31 = vpop.f32.mrf.mxu0 }
 0x337   :  { %4853 = dma.done.wait [#allocation4], 128  }
 0x338   :  { %4854 = vsyncadd [#allocation4], 4294967168 }
 0x339   :  { %3590 = vsyncpa [#allocation3], 1 }
 0x33a   :  { %3591 = vsyncpa [#allocation6], 1 }
 0x33b   :  { %3592 = vsyncpa [#allocation9], 1 }
 0x33c   :  { %3593 = vsyncpa [#allocation4], 1 }

</bundles_post_ra>
